<compile_context>
chip_gen: v5e
topology: v5e:2x2
jax: 0.10.0
libtpu: 0.0.40
codegen_flags: <defaults>
</compile_context>

<pallas_src>
import jax
import jax.numpy as jnp
from jax import lax
from jax.experimental import pallas as pl
from jax.experimental.pallas import tpu as pltpu

EPS = 1e-5
VMEM_LIMIT = 48 * 1024 * 1024  # legal on v5e/v6e (128 MiB) and v7x (64 MiB physical)


def _round_up(x, m):
    return (x + m - 1) // m * m


def _mosaic_params(*sem):
    return pltpu.CompilerParams(dimension_semantics=sem, vmem_limit_bytes=VMEM_LIMIT)


# ---------------------------------------------------------------------------
# Conv kernel over host-prepared stride-phase planes (conv1 and 1x1 shortcut)
# ---------------------------------------------------------------------------
def _make_conv_kernel(taps, n_rows, wo, wq):
    """taps: list of (flat_row_offset, plane_index) — one entry per filter tap.

    xq_ref : (1, P, Hq*Wq, Cin) bf16   flattened padded phase planes (VMEM resident)
    w_ref  : (T, Cin, Ct)       bf16   per-tap weight matrices (Cout tile Ct)
    o_ref  : (1, Ho*Wq, Ct)     bf16   "wide" conv output (cols >= wo are garbage)
    sum/sq : (1, 1, Ct)         f32    per-image per-channel sum / sum-of-squares
    """

    def kernel(xq_ref, w_ref, o_ref, sum_ref, sq_ref):
        # K*K accumulated MXU matmuls over shifted contiguous windows of the
        # VMEM-resident input.  The accumulator is a register value: no scratch,
        # single store, no per-tap read-modify-write traffic (review items 2/3).
        # TODO(synk): for small-Cin layers, stack taps along the contraction dim
        # (as done in the conv2 kernel) once Cin is lane-tile aligned.
        acc = None
        for t, (off, plane) in enumerate(taps):
            a = xq_ref[0, plane, pl.ds(off, n_rows), :]          # (n_rows, Cin) bf16
            p = jnp.dot(a, w_ref[t], preferred_element_type=jnp.float32)
            acc = p if acc is None else acc + p
        o_ref[0] = acc.astype(o_ref.dtype)                       # bf16 wide output

        # Fused BN batch-stats epilogue from the f32 accumulator (mask garbage cols).
        col = lax.broadcasted_iota(jnp.int32, (n_rows, 1), 0) % wq
        accv = jnp.where(col < wo, acc, 0.0)
        c = accv.shape[-1]
        sum_ref[...] = jnp.sum(accv, axis=0, keepdims=True).reshape(1, 1, c)
        sq_ref[...] = jnp.sum(accv * accv, axis=0, keepdims=True).reshape(1, 1, c)

    return kernel


def pallas_conv(xq, w_taps, taps, ho, wo, wq, cout_p):
    """Conv via shifted-window matmuls.  Returns (wide_out_bf16, ch_sum, ch_sumsq)."""
    n, p, lq, cin = xq.shape
    t = w_taps.shape[0]
    n_rows = ho * wq
    tc = 256 if cout_p % 256 == 0 else 128       # lane tile matched to MXU width
    kernel = _make_conv_kernel(taps, n_rows, wo, wq)
    out, sums, sqs = pl.pallas_call(
        kernel,
        out_shape=(
            jax.ShapeDtypeStruct((n, n_rows, cout_p), jnp.bfloat16),
            jax.ShapeDtypeStruct((n, 1, cout_p), jnp.float32),
            jax.ShapeDtypeStruct((n, 1, cout_p), jnp.float32),
        ),
        # Cout-tile axis outermost, batch innermost: the weight tile is DMA'd once
        # and stays VMEM-resident across the whole batch (review item 6).
        grid=(cout_p // tc, n),
        in_specs=[
            pl.BlockSpec((1, p, lq, cin), lambda j, i: (i, 0, 0, 0)),
            pl.BlockSpec((t, cin, tc), lambda j, i: (0, 0, j)),
        ],
        out_specs=(
            pl.BlockSpec((1, n_rows, tc), lambda j, i: (i, 0, j)),
            pl.BlockSpec((1, 1, tc), lambda j, i: (i, 0, j)),
            pl.BlockSpec((1, 1, tc), lambda j, i: (i, 0, j)),
        ),
        compiler_params=_mosaic_params("parallel", "parallel"),
    )(xq, w_taps)
    return out, jnp.sum(sums[:, 0, :], axis=0), jnp.sum(sqs[:, 0, :], axis=0)


# ---------------------------------------------------------------------------
# conv2 kernel with fused BN1-apply + ReLU prologue (no HBM pass in between)
# ---------------------------------------------------------------------------
def _make_conv2_kernel(n_rows, wo, wq, cin_p, n_taps, group, plane_rows):
    lead = wq + 1                      # flat offset of activation (1,1) in padded plane
    trail_start = (lead + n_rows) // 8 * 8

    def kernel(y1_ref, s_ref, b_ref, w_ref, o_ref, sum_ref, sq_ref, plane_ref):
        col = lax.broadcasted_iota(jnp.int32, (n_rows, 1), 0) % wq

        # --- fused BN1 apply + ReLU prologue (conv1 output already in VMEM) --------
        a = jnp.maximum(y1_ref[0].astype(jnp.float32) * s_ref[0] + b_ref[0], 0.0)
        a = jnp.where(col < wo, a, 0.0)     # garbage cols double as the zero border

        # Assemble the zero-bordered conv2 input plane in VMEM.  Zero the border
        # strips first, then store the activation; all stores are 8-row aligned
        # because wq was chosen with (wq + 1) % 8 == 0.
        plane_ref[pl.ds(0, lead), :] = jnp.zeros((lead, cin_p), jnp.float32)
        plane_ref[pl.ds(trail_start, plane_rows - trail_start), :] = jnp.zeros(
            (plane_rows - trail_start, cin_p), jnp.float32)
        plane_ref[pl.ds(lead, n_rows), :] = a

        # --- 3x3 tap matmuls, paired along the contraction dim (review item 9) -----
        acc = None
        for g0 in range(0, n_taps, group):
            g = min(group, n_taps - g0)
            wins = [plane_ref[pl.ds((t // 3) * wq + (t % 3), n_rows), :]
                    for t in range(g0, g0 + g)]
            amat = wins[0] if g == 1 else jnp.concatenate(wins, axis=-1)
            wmat = w_ref[pl.ds(g0 * cin_p, g * cin_p), :]
            p = jnp.dot(amat.astype(jnp.bfloat16), wmat,
                        preferred_element_type=jnp.float32)
            acc = p if acc is None else acc + p
        o_ref[0] = acc.astype(o_ref.dtype)

        accv = jnp.where(col < wo, acc, 0.0)
        c = accv.shape[-1]
        sum_ref[...] = jnp.sum(accv, axis=0, keepdims=True).reshape(1, 1, c)
        sq_ref[...] = jnp.sum(accv * accv, axis=0, keepdims=True).reshape(1, 1, c)

    return kernel


def pallas_conv2(y1, s1, b1, w_flat, ho, wo, wq, cout_p):
    n, n_rows, cin_p = y1.shape
    n_taps = 9
    tc = 256 if cout_p % 256 == 0 else 128
    group = max(1, 256 // cin_p) if cin_p % 128 == 0 else 1
    plane_rows = _round_up(n_rows + 2 * wq + 2, 8)
    kernel = _make_conv2_kernel(n_rows, wo, wq, cin_p, n_taps, group, plane_rows)
    out, sums, sqs = pl.pallas_call(
        kernel,
        out_shape=(
            jax.ShapeDtypeStruct((n, n_rows, cout_p), jnp.bfloat16),
            jax.ShapeDtypeStruct((n, 1, cout_p), jnp.float32),
            jax.ShapeDtypeStruct((n, 1, cout_p), jnp.float32),
        ),
        grid=(cout_p // tc, n),
        in_specs=[
            pl.BlockSpec((1, n_rows, cin_p), lambda j, i: (i, 0, 0)),
            pl.BlockSpec((1, 1, cin_p), lambda j, i: (0, 0, 0)),
            pl.BlockSpec((1, 1, cin_p), lambda j, i: (0, 0, 0)),
            pl.BlockSpec((n_taps * cin_p, tc), lambda j, i: (0, j)),
        ],
        out_specs=(
            pl.BlockSpec((1, n_rows, tc), lambda j, i: (i, 0, j)),
            pl.BlockSpec((1, 1, tc), lambda j, i: (i, 0, j)),
            pl.BlockSpec((1, 1, tc), lambda j, i: (i, 0, j)),
        ),
        scratch_shapes=[pltpu.VMEM((plane_rows, cin_p), jnp.float32)],
        compiler_params=_mosaic_params("parallel", "parallel"),
    )(y1, s1, b1, w_flat)
    return out, jnp.sum(sums[:, 0, :], axis=0), jnp.sum(sqs[:, 0, :], axis=0)


# ---------------------------------------------------------------------------
# Fused final kernels: BN2-apply + residual add + ReLU (narrow inside the kernel)
# ---------------------------------------------------------------------------
def _make_final_proj_kernel(wo, c_out):
    def kernel(y_ref, s_ref, r_ref, t_ref, bias_ref, o_ref):
        y = y_ref[0, :, :wo, :c_out].astype(jnp.float32)
        r = r_ref[0, :, :, :c_out].astype(jnp.float32)
        v = (y * s_ref[:, :, :c_out] + r * t_ref[:, :, :c_out]
             + bias_ref[:, :, :c_out])
        o_ref[0] = jnp.maximum(v, 0.0)
    return kernel


def _make_final_id_kernel(wo, c_out):
    def kernel(y_ref, s_ref, bias_ref, x_ref, o_ref):
        y = y_ref[0, :, :wo, :c_out].astype(jnp.float32)
        v = y * s_ref[:, :, :c_out] + bias_ref[:, :, :c_out] + x_ref[0]
        o_ref[0] = jnp.maximum(v, 0.0)
    return kernel


# TODO(synk): emit bf16 here instead of f32 if the consumer of the block takes bf16
# (halves the final HBM write); kept f32 to match the reference module's output.
def pallas_final_proj(y2_img, s_main, r_img, s_res, bias, c_out):
    n, ho, wq, cp = y2_img.shape
    wo = r_img.shape[2]
    return pl.pallas_call(
        _make_final_proj_kernel(wo, c_out),
        out_shape=jax.ShapeDtypeStruct((n, ho, wo, c_out), jnp.float32),
        grid=(n,),
        in_specs=[pl.BlockSpec((1, ho, wq, cp), lambda i: (i, 0, 0, 0)),
                  pl.BlockSpec((1, 1, cp), lambda i: (0, 0, 0)),
                  pl.BlockSpec((1, ho, wo, cp), lambda i: (i, 0, 0, 0)),
                  pl.BlockSpec((1, 1, cp), lambda i: (0, 0, 0)),
                  pl.BlockSpec((1, 1, cp), lambda i: (0, 0, 0))],
        out_specs=pl.BlockSpec((1, ho, wo, c_out), lambda i: (i, 0, 0, 0)),
        compiler_params=_mosaic_params("parallel"),
    )(y2_img, s_main, r_img, s_res, bias)


def pallas_final_id(y2_img, s_main, bias, x_img, c_out):
    n, ho, wq, cp = y2_img.shape
    wo = x_img.shape[2]
    return pl.pallas_call(
        _make_final_id_kernel(wo, c_out),
        out_shape=jax.ShapeDtypeStruct((n, ho, wo, c_out), jnp.float32),
        grid=(n,),
        in_specs=[pl.BlockSpec((1, ho, wq, cp), lambda i: (i, 0, 0, 0)),
                  pl.BlockSpec((1, 1, cp), lambda i: (0, 0, 0)),
                  pl.BlockSpec((1, 1, cp), lambda i: (0, 0, 0)),
                  pl.BlockSpec((1, ho, wo, c_out), lambda i: (i, 0, 0, 0))],
        out_specs=pl.BlockSpec((1, ho, wo, c_out), lambda i: (i, 0, 0, 0)),
        compiler_params=_mosaic_params("parallel"),
    )(y2_img, s_main, bias, x_img)


# ---------------------------------------------------------------------------
# Glue: phase-plane prep, weight layouts, BN folding, params
# ---------------------------------------------------------------------------
def _conv_plane_prep(x, ksize, stride, pad, wq):
    """Pad + decompose into stride-phase planes, flattened to (N, P, Hq*Wq, C) bf16.

    Each tap's contribution to the "wide" (Ho x Wq) output is a contiguous Ho*Wq-row
    window of one flattened plane (no im2col, no strided loads in the kernel).
    """
    n, h, w, c = x.shape
    xp = jnp.pad(x, ((0, 0), (pad, pad), (pad, pad), (0, 0)))
    hp, wp = h + 2 * pad, w + 2 * pad
    ho = (hp - ksize) // stride + 1
    wo = (wp - ksize) // stride + 1
    ext = (ksize - 1) // stride
    assert wq >= wo + ext
    hq = ho + ext + (1 if ext > 0 else 0)
    used, taps = [], []
    for di in range(ksize):
        for dj in range(ksize):
            key = (di % stride, dj % stride)
            if key not in used:
                used.append(key)
            taps.append(((di // stride) * wq + (dj // stride), used.index(key)))
    planes = []
    for (a, b) in used:
        p = xp[:, a::stride, b::stride, :][:, :hq, :wq, :]
        p = jnp.pad(p, ((0, 0), (0, hq - p.shape[1]), (0, wq - p.shape[2]), (0, 0)))
        planes.append(p.reshape(n, hq * wq, c))
    xq = jnp.stack(planes, axis=1).astype(jnp.bfloat16)
    return xq, taps


def _w_taps(w_oihw, cout_p):
    """(Cout, Cin, kh, kw) -> (kh*kw, Cin, Cout_p) bf16, tap order (di, dj) row-major."""
    cout, cin, kh, kw = w_oihw.shape
    w = jnp.transpose(w_oihw, (2, 3, 1, 0)).reshape(kh * kw, cin, cout)
    return jnp.pad(w, ((0, 0), (0, 0), (0, cout_p - cout))).astype(jnp.bfloat16)


def _w_flat(w_oihw, cin_p, cout_p):
    """(Cout, Cin, kh, kw) -> (kh*kw*Cin_p, Cout_p) bf16 (taps stacked along rows)."""
    cout, cin, kh, kw = w_oihw.shape
    w = jnp.transpose(w_oihw, (2, 3, 1, 0))
    w = jnp.pad(w, ((0, 0), (0, 0), (0, cin_p - cin), (0, cout_p - cout)))
    return w.reshape(kh * kw * cin_p, cout_p).astype(jnp.bfloat16)


def _fold_bn(sums, sqs, gamma, beta, m, cp):
    """Training-mode BN folded into per-channel scale/bias (stats from conv epilogue)."""
    mean = sums / m
    var = jnp.maximum(sqs / m - mean * mean, 0.0)
    # TODO(synk): E[x^2]-E[x]^2 matches the reference but is cancellation-prone for
    # very large activations; a centered (Welford-style) second pass would be safer.
    gp = jnp.pad(gamma, (0, cp - gamma.shape[0]))
    bp = jnp.pad(beta, (0, cp - beta.shape[0]))
    scale = gp / jnp.sqrt(var + EPS)
    bias = bp - mean * scale
    return scale.reshape(1, 1, cp), bias.reshape(1, 1, cp)


def init_params(key, inchannel, outchannel, stride):
    ks = jax.random.split(key, 9)

    def bn_init(kg, kb):
        return (1.0 + 0.1 * jax.random.normal(kg, (outchannel,), jnp.float32),
                0.1 * jax.random.normal(kb, (outchannel,), jnp.float32))

    g1, b1 = bn_init(ks[1], ks[2])
    g2, b2 = bn_init(ks[4], ks[5])
    params = {
        "conv1_w": 0.1 * jax.random.normal(ks[0], (outchannel, inchannel, 3, 3), jnp.float32),
        "bn1_gamma": g1, "bn1_beta": b1,
        "conv2_w": 0.1 * jax.random.normal(ks[3], (outchannel, outchannel, 3, 3), jnp.float32),
        "bn2_gamma": g2, "bn2_beta": b2,
    }
    if stride != 1 or inchannel != outchannel:
        gs, bs = bn_init(ks[7], ks[8])
        params["convs_w"] = 0.1 * jax.random.normal(ks[6], (outchannel, inchannel, 1, 1), jnp.float32)
        params["bns_gamma"] = gs
        params["bns_beta"] = bs
    return params


# ---------------------------------------------------------------------------
# Forward pass
# ---------------------------------------------------------------------------
def residual_block_forward(x_nchw, params, stride):
    x = jnp.transpose(x_nchw, (0, 2, 3, 1)).astype(jnp.float32)      # NHWC
    n, h, w_, cin = x.shape
    cout = params["conv1_w"].shape[0]
    cp = _round_up(cout, 128)                                        # lane-dense Cout
    ho = (h + 2 - 3) // stride + 1
    wo = (w_ + 2 - 3) // stride + 1
    # Wide width shared by conv1's output and conv2's in-kernel plane.  Chosen with
    # (wq + 1) % 8 == 0 so conv2's plane stores are sublane-aligned (accepted tradeoff:
    # conv1's tap-load offsets keep a small static misalignment).
    wq = wo + 2
    wq += (7 - wq % 8) % 8
    m = n * ho * wo

    # conv1 (3x3 / stride, pad 1) with fused BN1-stats epilogue
    xq1, taps1 = _conv_plane_prep(x, 3, stride, 1, wq)
    y1, sum1, sq1 = pallas_conv(xq1, _w_taps(params["conv1_w"], cp), taps1, ho, wo, wq, cp)
    s1, b1 = _fold_bn(sum1, sq1, params["bn1_gamma"], params["bn1_beta"], m, cp)

    # conv2 (3x3 / 1, pad 1): BN1-apply + ReLU fused into its prologue, BN2 stats in
    # its epilogue — the activation never takes an extra HBM round trip.
    w2 = _w_flat(params["conv2_w"], cp, cp)
    y2, sum2, sq2 = pallas_conv2(y1, s1, b1, w2, ho, wo, wq, cp)
    s2, b2 = _fold_bn(sum2, sq2, params["bn2_gamma"], params["bn2_beta"], m, cp)

    y2_img = y2.reshape(n, ho, wq, cp)                               # free reshape
    if "convs_w" in params:
        # projection shortcut: 1x1 / stride conv (ext == 0, output already compact)
        xqs, tapss = _conv_plane_prep(x, 1, stride, 0, wo)
        r, sums_, sqs_ = pallas_conv(xqs, _w_taps(params["convs_w"], cp), tapss,
                                     ho, wo, wo, cp)
        ss, sb = _fold_bn(sums_, sqs_, params["bns_gamma"], params["bns_beta"], m, cp)
        out = pallas_final_proj(y2_img, s2, r.reshape(n, ho, wo, cp), ss, b2 + sb, cout)
    else:
        out = pallas_final_id(y2_img, s2, b2, x, cout)               # x is (n, ho, wo, cout)
    return jnp.transpose(out, (0, 3, 1, 2))                          # back to NCHW


# ---------------------------------------------------------------------------
# Pure-JAX reference (mirrors the bf16 matmul-input staging of the Pallas path)
# ---------------------------------------------------------------------------
def _ref_forward(x_nchw, params, stride):
    x = jnp.transpose(x_nchw, (0, 2, 3, 1)).astype(jnp.float32)

    def conv(inp, w_oihw, s, pad):
        wh = jnp.transpose(w_oihw, (2, 3, 1, 0)).astype(jnp.bfloat16)  # HWIO
        return lax.conv_general_dilated(
            inp.astype(jnp.bfloat16), wh, (s, s), ((pad, pad), (pad, pad)),
            dimension_numbers=("NHWC", "HWIO", "NHWC"),
            preferred_element_type=jnp.float32)

    def bn(y, gamma, beta):
        mean = jnp.mean(y, axis=(0, 1, 2))
        var = jnp.mean(jnp.square(y), axis=(0, 1, 2)) - mean * mean
        return (y - mean) / jnp.sqrt(var + EPS) * gamma + beta

    a1 = jax.nn.relu(bn(conv(x, params["conv1_w"], stride, 1),
                        params["bn1_gamma"], params["bn1_beta"]))
    y2 = bn(conv(a1, params["conv2_w"], 1, 1),
            params["bn2_gamma"], params["bn2_beta"])
    if "convs_w" in params:
        sc = bn(conv(x, params["convs_w"], stride, 0),
                params["bns_gamma"], params["bns_beta"])
    else:
        sc = x
    return jnp.transpose(jax.nn.relu(y2 + sc), (0, 3, 1, 2))


# ---------------------------------------------------------------------------
if __name__ == "__main__":
    key = jax.random.PRNGKey(0)
    kx1, kp1, kx2, kp2 = jax.random.split(key, 4)

    # bf16 wide intermediates (accuracy/traffic tradeoff flagged in the review):
    # validate against the f32-intermediate reference at 2e-2.
    ATOL = RTOL = 2e-2

    # Projection-shortcut path: stride 2, Cin != Cout.
    x_proj = jax.random.normal(kx1, (2, 4, 16, 16), jnp.float32)       # NCHW like PyTorch
    params_proj = init_params(kp1, 4, 8, 2)
    out_proj = jax.block_until_ready(residual_block_forward(x_proj, params_proj, 2))
    ref_proj = jax.block_until_ready(_ref_forward(x_proj, params_proj, 2))
    assert out_proj.shape == (2, 8, 8, 8), out_proj.shape
    assert jnp.allclose(out_proj, ref_proj, atol=ATOL, rtol=RTOL), \
        float(jnp.max(jnp.abs(out_proj - ref_proj)))

    # Identity-shortcut path: stride 1, Cin == Cout.
    x_id = jax.random.normal(kx2, (2, 8, 16, 16), jnp.float32)
    params_id = init_params(kp2, 8, 8, 1)
    out_id = jax.block_until_ready(residual_block_forward(x_id, params_id, 1))
    ref_id = jax.block_until_ready(_ref_forward(x_id, params_id, 1))
    assert out_id.shape == (2, 8, 16, 16), out_id.shape
    assert jnp.allclose(out_id, ref_id, atol=ATOL, rtol=RTOL), \
        float(jnp.max(jnp.abs(out_id - ref_id)))

    print("KERNEL_OK")
</pallas_src>

<mosaic_0001>
module attributes {stable_mosaic.version = 11 : i64} {
  func.func @kernel(%arg0: i32, %arg1: i32, %arg2: memref<1x4x150x4xbf16, #tpu.memory_space<vmem>>, %arg3: memref<9x4x128xbf16, #tpu.memory_space<vmem>>, %arg4: memref<1x120x128xbf16, #tpu.memory_space<vmem>>, %arg5: memref<1x1x128xf32, #tpu.memory_space<vmem>>, %arg6: memref<1x1x128xf32, #tpu.memory_space<vmem>>) attributes {dimension_semantics = [#tpu.dimension_semantics<parallel>, #tpu.dimension_semantics<parallel>], iteration_bounds = array<i64: 1, 2>, scalar_prefetch = 0 : i64, scratch_operands = 0 : i64, tpu.core_type = #tpu.core_type<tc>, window_params = [{transform_indices = @transform_0, window_bounds = array<i64: 1, 4, 150, 4>}, {transform_indices = @transform_1, window_bounds = array<i64: 9, 4, 128>}, {transform_indices = @transform_2, window_bounds = array<i64: 1, 120, 128>}, {transform_indices = @transform_3, window_bounds = array<i64: 1, 1, 128>}, {transform_indices = @transform_4, window_bounds = array<i64: 1, 1, 128>}]} {
    %c0 = arith.constant 0 : index
    %c0_0 = arith.constant 0 : index
    %c0_1 = arith.constant 0 : index
    %c0_2 = arith.constant 0 : index
    %0 = vector.load %arg2[%c0, %c0_0, %c0_1, %c0_2] : memref<1x4x150x4xbf16, #tpu.memory_space<vmem>>, vector<1x1x120x4xbf16>
    %1 = vector.shape_cast %0 : vector<1x1x120x4xbf16> to vector<120x4xbf16>
    %c0_3 = arith.constant 0 : index
    %c0_4 = arith.constant 0 : index
    %c0_5 = arith.constant 0 : index
    %2 = vector.load %arg3[%c0_3, %c0_4, %c0_5] : memref<9x4x128xbf16, #tpu.memory_space<vmem>>, vector<1x4x128xbf16>
    %3 = vector.shape_cast %2 : vector<1x4x128xbf16> to vector<4x128xbf16>
    %cst = arith.constant dense<0.000000e+00> : vector<120x128xf32>
    %4 = tpu.matmul %1, %3, %cst {dimension_numbers = #tpu.dot_dimension_numbers<[1], [0], [0], [1], [0, 0, 1, 1], [], []>} : vector<120x4xbf16>, vector<4x128xbf16>, vector<120x128xf32> -> vector<120x128xf32>
    %c0_6 = arith.constant 0 : index
    %c1 = arith.constant 1 : index
    %c0_7 = arith.constant 0 : index
    %c0_8 = arith.constant 0 : index
    %5 = vector.load %arg2[%c0_6, %c1, %c0_7, %c0_8] : memref<1x4x150x4xbf16, #tpu.memory_space<vmem>>, vector<1x1x120x4xbf16>
    %6 = vector.shape_cast %5 : vector<1x1x120x4xbf16> to vector<120x4xbf16>
    %c1_9 = arith.constant 1 : index
    %c0_10 = arith.constant 0 : index
    %c0_11 = arith.constant 0 : index
    %7 = vector.load %arg3[%c1_9, %c0_10, %c0_11] : memref<9x4x128xbf16, #tpu.memory_space<vmem>>, vector<1x4x128xbf16>
    %8 = vector.shape_cast %7 : vector<1x4x128xbf16> to vector<4x128xbf16>
    %cst_12 = arith.constant dense<0.000000e+00> : vector<120x128xf32>
    %9 = tpu.matmul %6, %8, %cst_12 {dimension_numbers = #tpu.dot_dimension_numbers<[1], [0], [0], [1], [0, 0, 1, 1], [], []>} : vector<120x4xbf16>, vector<4x128xbf16>, vector<120x128xf32> -> vector<120x128xf32>
    %10 = arith.addf %4, %9 : vector<120x128xf32>
    %c0_13 = arith.constant 0 : index
    %c0_14 = arith.constant 0 : index
    %c1_15 = arith.constant 1 : index
    %c0_16 = arith.constant 0 : index
    %11 = vector.load %arg2[%c0_13, %c0_14, %c1_15, %c0_16] : memref<1x4x150x4xbf16, #tpu.memory_space<vmem>>, vector<1x1x120x4xbf16>
    %12 = vector.shape_cast %11 : vector<1x1x120x4xbf16> to vector<120x4xbf16>
    %c2 = arith.constant 2 : index
    %c0_17 = arith.constant 0 : index
    %c0_18 = arith.constant 0 : index
    %13 = vector.load %arg3[%c2, %c0_17, %c0_18] : memref<9x4x128xbf16, #tpu.memory_space<vmem>>, vector<1x4x128xbf16>
    %14 = vector.shape_cast %13 : vector<1x4x128xbf16> to vector<4x128xbf16>
    %cst_19 = arith.constant dense<0.000000e+00> : vector<120x128xf32>
    %15 = tpu.matmul %12, %14, %cst_19 {dimension_numbers = #tpu.dot_dimension_numbers<[1], [0], [0], [1], [0, 0, 1, 1], [], []>} : vector<120x4xbf16>, vector<4x128xbf16>, vector<120x128xf32> -> vector<120x128xf32>
    %16 = arith.addf %10, %15 : vector<120x128xf32>
    %c0_20 = arith.constant 0 : index
    %c2_21 = arith.constant 2 : index
    %c0_22 = arith.constant 0 : index
    %c0_23 = arith.constant 0 : index
    %17 = vector.load %arg2[%c0_20, %c2_21, %c0_22, %c0_23] : memref<1x4x150x4xbf16, #tpu.memory_space<vmem>>, vector<1x1x120x4xbf16>
    %18 = vector.shape_cast %17 : vector<1x1x120x4xbf16> to vector<120x4xbf16>
    %c3 = arith.constant 3 : index
    %c0_24 = arith.constant 0 : index
    %c0_25 = arith.constant 0 : index
    %19 = vector.load %arg3[%c3, %c0_24, %c0_25] : memref<9x4x128xbf16, #tpu.memory_space<vmem>>, vector<1x4x128xbf16>
    %20 = vector.shape_cast %19 : vector<1x4x128xbf16> to vector<4x128xbf16>
    %cst_26 = arith.constant dense<0.000000e+00> : vector<120x128xf32>
    %21 = tpu.matmul %18, %20, %cst_26 {dimension_numbers = #tpu.dot_dimension_numbers<[1], [0], [0], [1], [0, 0, 1, 1], [], []>} : vector<120x4xbf16>, vector<4x128xbf16>, vector<120x128xf32> -> vector<120x128xf32>
    %22 = arith.addf %16, %21 : vector<120x128xf32>
    %c0_27 = arith.constant 0 : index
    %c3_28 = arith.constant 3 : index
    %c0_29 = arith.constant 0 : index
    %c0_30 = arith.constant 0 : index
    %23 = vector.load %arg2[%c0_27, %c3_28, %c0_29, %c0_30] : memref<1x4x150x4xbf16, #tpu.memory_space<vmem>>, vector<1x1x120x4xbf16>
    %24 = vector.shape_cast %23 : vector<1x1x120x4xbf16> to vector<120x4xbf16>
    %c4 = arith.constant 4 : index
    %c0_31 = arith.constant 0 : index
    %c0_32 = arith.constant 0 : index
    %25 = vector.load %arg3[%c4, %c0_31, %c0_32] : memref<9x4x128xbf16, #tpu.memory_space<vmem>>, vector<1x4x128xbf16>
    %26 = vector.shape_cast %25 : vector<1x4x128xbf16> to vector<4x128xbf16>
    %cst_33 = arith.constant dense<0.000000e+00> : vector<120x128xf32>
    %27 = tpu.matmul %24, %26, %cst_33 {dimension_numbers = #tpu.dot_dimension_numbers<[1], [0], [0], [1], [0, 0, 1, 1], [], []>} : vector<120x4xbf16>, vector<4x128xbf16>, vector<120x128xf32> -> vector<120x128xf32>
    %28 = arith.addf %22, %27 : vector<120x128xf32>
    %c0_34 = arith.constant 0 : index
    %c2_35 = arith.constant 2 : index
    %c1_36 = arith.constant 1 : index
    %c0_37 = arith.constant 0 : index
    %29 = vector.load %arg2[%c0_34, %c2_35, %c1_36, %c0_37] : memref<1x4x150x4xbf16, #tpu.memory_space<vmem>>, vector<1x1x120x4xbf16>
    %30 = vector.shape_cast %29 : vector<1x1x120x4xbf16> to vector<120x4xbf16>
    %c5 = arith.constant 5 : index
    %c0_38 = arith.constant 0 : index
    %c0_39 = arith.constant 0 : index
    %31 = vector.load %arg3[%c5, %c0_38, %c0_39] : memref<9x4x128xbf16, #tpu.memory_space<vmem>>, vector<1x4x128xbf16>
    %32 = vector.shape_cast %31 : vector<1x4x128xbf16> to vector<4x128xbf16>
    %cst_40 = arith.constant dense<0.000000e+00> : vector<120x128xf32>
    %33 = tpu.matmul %30, %32, %cst_40 {dimension_numbers = #tpu.dot_dimension_numbers<[1], [0], [0], [1], [0, 0, 1, 1], [], []>} : vector<120x4xbf16>, vector<4x128xbf16>, vector<120x128xf32> -> vector<120x128xf32>
    %34 = arith.addf %28, %33 : vector<120x128xf32>
    %c0_41 = arith.constant 0 : index
    %c0_42 = arith.constant 0 : index
    %c15 = arith.constant 15 : index
    %c0_43 = arith.constant 0 : index
    %35 = vector.load %arg2[%c0_41, %c0_42, %c15, %c0_43] : memref<1x4x150x4xbf16, #tpu.memory_space<vmem>>, vector<1x1x120x4xbf16>
    %36 = vector.shape_cast %35 : vector<1x1x120x4xbf16> to vector<120x4xbf16>
    %c6 = arith.constant 6 : index
    %c0_44 = arith.constant 0 : index
    %c0_45 = arith.constant 0 : index
    %37 = vector.load %arg3[%c6, %c0_44, %c0_45] : memref<9x4x128xbf16, #tpu.memory_space<vmem>>, vector<1x4x128xbf16>
    %38 = vector.shape_cast %37 : vector<1x4x128xbf16> to vector<4x128xbf16>
    %cst_46 = arith.constant dense<0.000000e+00> : vector<120x128xf32>
    %39 = tpu.matmul %36, %38, %cst_46 {dimension_numbers = #tpu.dot_dimension_numbers<[1], [0], [0], [1], [0, 0, 1, 1], [], []>} : vector<120x4xbf16>, vector<4x128xbf16>, vector<120x128xf32> -> vector<120x128xf32>
    %40 = arith.addf %34, %39 : vector<120x128xf32>
    %c0_47 = arith.constant 0 : index
    %c1_48 = arith.constant 1 : index
    %c15_49 = arith.constant 15 : index
    %c0_50 = arith.constant 0 : index
    %41 = vector.load %arg2[%c0_47, %c1_48, %c15_49, %c0_50] : memref<1x4x150x4xbf16, #tpu.memory_space<vmem>>, vector<1x1x120x4xbf16>
    %42 = vector.shape_cast %41 : vector<1x1x120x4xbf16> to vector<120x4xbf16>
    %c7 = arith.constant 7 : index
    %c0_51 = arith.constant 0 : index
    %c0_52 = arith.constant 0 : index
    %43 = vector.load %arg3[%c7, %c0_51, %c0_52] : memref<9x4x128xbf16, #tpu.memory_space<vmem>>, vector<1x4x128xbf16>
    %44 = vector.shape_cast %43 : vector<1x4x128xbf16> to vector<4x128xbf16>
    %cst_53 = arith.constant dense<0.000000e+00> : vector<120x128xf32>
    %45 = tpu.matmul %42, %44, %cst_53 {dimension_numbers = #tpu.dot_dimension_numbers<[1], [0], [0], [1], [0, 0, 1, 1], [], []>} : vector<120x4xbf16>, vector<4x128xbf16>, vector<120x128xf32> -> vector<120x128xf32>
    %46 = arith.addf %40, %45 : vector<120x128xf32>
    %c0_54 = arith.constant 0 : index
    %c0_55 = arith.constant 0 : index
    %c16 = arith.constant 16 : index
    %c0_56 = arith.constant 0 : index
    %47 = vector.load %arg2[%c0_54, %c0_55, %c16, %c0_56] : memref<1x4x150x4xbf16, #tpu.memory_space<vmem>>, vector<1x1x120x4xbf16>
    %48 = vector.shape_cast %47 : vector<1x1x120x4xbf16> to vector<120x4xbf16>
    %c8 = arith.constant 8 : index
    %c0_57 = arith.constant 0 : index
    %c0_58 = arith.constant 0 : index
    %49 = vector.load %arg3[%c8, %c0_57, %c0_58] : memref<9x4x128xbf16, #tpu.memory_space<vmem>>, vector<1x4x128xbf16>
    %50 = vector.shape_cast %49 : vector<1x4x128xbf16> to vector<4x128xbf16>
    %cst_59 = arith.constant dense<0.000000e+00> : vector<120x128xf32>
    %51 = tpu.matmul %48, %50, %cst_59 {dimension_numbers = #tpu.dot_dimension_numbers<[1], [0], [0], [1], [0, 0, 1, 1], [], []>} : vector<120x4xbf16>, vector<4x128xbf16>, vector<120x128xf32> -> vector<120x128xf32>
    %52 = arith.addf %46, %51 : vector<120x128xf32>
    %53 = arith.truncf %52 : vector<120x128xf32> to vector<120x128xbf16>
    %c0_60 = arith.constant 0 : index
    %c0_61 = arith.constant 0 : index
    %c0_62 = arith.constant 0 : index
    %54 = vector.load %arg4[%c0_60, %c0_61, %c0_62] : memref<1x120x128xbf16, #tpu.memory_space<vmem>>, vector<1x120x128xbf16>
    %55 = vector.shape_cast %54 : vector<1x120x128xbf16> to vector<120x128xbf16>
    %56 = vector.shape_cast %53 : vector<120x128xbf16> to vector<1x120x128xbf16>
    tpu.vector_store %arg4[%c0_60, %c0_61, %c0_62], %56 {strides = array<i32>} : memref<1x120x128xbf16, #tpu.memory_space<vmem>>, vector<1x120x128xbf16>,
    %57 = tpu.iota {dimensions = array<i32: 0>} : vector<120x1xi32>
    %c15_i32 = arith.constant 15 : i32
    %c0_i32 = arith.constant 0 : i32
    %58 = arith.cmpi eq, %c15_i32, %c0_i32 : i32
    %c1_i32 = arith.constant 1 : i32
    %59 = arith.select %58, %c1_i32, %c15_i32 : i32
    %60 = vector.broadcast %59 : i32 to vector<120x1xi32>
    %61 = arith.remsi %57, %60 : vector<120x1xi32>
    %c0_i32_63 = arith.constant 0 : i32
    %62 = vector.broadcast %c0_i32_63 : i32 to vector<120x1xi32>
    %63 = arith.cmpi ne, %61, %62 : vector<120x1xi32>
    %c0_i32_64 = arith.constant 0 : i32
    %64 = vector.broadcast %c0_i32_64 : i32 to vector<120x1xi32>
    %65 = arith.cmpi slt, %61, %64 : vector<120x1xi32>
    %c0_i32_65 = arith.constant 0 : i32
    %66 = arith.cmpi slt, %59, %c0_i32_65 : i32
    %67 = vector.broadcast %66 : i1 to vector<120x1xi1>
    %68 = vector.broadcast %67 : vector<120x1xi1> to vector<120x1xi1>
    %69 = arith.xori %65, %68 : vector<120x1xi1>
    %70 = arith.andi %69, %63 : vector<120x1xi1>
    %71 = vector.broadcast %59 : i32 to vector<120x1xi32>
    %72 = arith.addi %61, %71 : vector<120x1xi32>
    %73 = arith.select %70, %72, %61 : vector<120x1xi1>, vector<120x1xi32>
    %c8_i32 = arith.constant 8 : i32
    %74 = vector.broadcast %c8_i32 : i32 to vector<120x1xi32>
    %75 = arith.cmpi slt, %73, %74 : vector<120x1xi32>
    %cst_66 = arith.constant 0.000000e+00 : f32
    %76 = vector.shape_cast %75 : vector<120x1xi1> to vector<120x1xi1>
    %77 = vector.broadcast %76 : vector<120x1xi1> to vector<120x128xi1>
    %78 = vector.broadcast %cst_66 : f32 to vector<120x128xf32>
    %79 = arith.select %77, %52, %78 : vector<120x128xi1>, vector<120x128xf32>
    %cst_67 = arith.constant dense<0.000000e+00> : vector<128xf32>
    %80 = vector.multi_reduction <add>, %79, %cst_67 [0] : vector<120x128xf32> to vector<128xf32>
    %81 = vector.shape_cast %80 : vector<128xf32> to vector<1x128xf32>
    %82 = vector.shape_cast %81 : vector<1x128xf32> to vector<1x1x128xf32>
    %c0_68 = arith.constant 0 : index
    %c0_69 = arith.constant 0 : index
    %c0_70 = arith.constant 0 : index
    %83 = vector.load %arg5[%c0_68, %c0_69, %c0_70] : memref<1x1x128xf32, #tpu.memory_space<vmem>>, vector<1x1x128xf32>
    tpu.vector_store %arg5[%c0_68, %c0_69, %c0_70], %82 {strides = array<i32>} : memref<1x1x128xf32, #tpu.memory_space<vmem>>, vector<1x1x128xf32>,
    %84 = arith.mulf %79, %79 : vector<120x128xf32>
    %cst_71 = arith.constant dense<0.000000e+00> : vector<128xf32>
    %85 = vector.multi_reduction <add>, %84, %cst_71 [0] : vector<120x128xf32> to vector<128xf32>
    %86 = vector.shape_cast %85 : vector<128xf32> to vector<1x128xf32>
    %87 = vector.shape_cast %86 : vector<1x128xf32> to vector<1x1x128xf32>
    %c0_72 = arith.constant 0 : index
    %c0_73 = arith.constant 0 : index
    %c0_74 = arith.constant 0 : index
    %88 = vector.load %arg6[%c0_72, %c0_73, %c0_74] : memref<1x1x128xf32, #tpu.memory_space<vmem>>, vector<1x1x128xf32>
    tpu.vector_store %arg6[%c0_72, %c0_73, %c0_74], %87 {strides = array<i32>} : memref<1x1x128xf32, #tpu.memory_space<vmem>>, vector<1x1x128xf32>,
    return
  }
  func.func @transform_0(%arg0: i32, %arg1: i32) -> (i32, i32, i32, i32) {
    %c0_i32 = arith.constant 0 : i32
    %c0_i32_0 = arith.constant 0 : i32
    %c0_i32_1 = arith.constant 0 : i32
    %c0_i32_2 = arith.constant 0 : i32
    return %arg1, %c0_i32, %c0_i32_0, %c0_i32_1 : i32, i32, i32, i32
  }
  func.func @transform_1(%arg0: i32, %arg1: i32) -> (i32, i32, i32) {
    %c0_i32 = arith.constant 0 : i32
    %c0_i32_0 = arith.constant 0 : i32
    %c0_i32_1 = arith.constant 0 : i32
    return %c0_i32, %c0_i32_0, %arg0 : i32, i32, i32
  }
  func.func @transform_2(%arg0: i32, %arg1: i32) -> (i32, i32, i32) {
    %c0_i32 = arith.constant 0 : i32
    %c0_i32_0 = arith.constant 0 : i32
    return %arg1, %c0_i32, %arg0 : i32, i32, i32
  }
  func.func @transform_3(%arg0: i32, %arg1: i32) -> (i32, i32, i32) {
    %c0_i32 = arith.constant 0 : i32
    %c0_i32_0 = arith.constant 0 : i32
    return %arg1, %c0_i32, %arg0 : i32, i32, i32
  }
  func.func @transform_4(%arg0: i32, %arg1: i32) -> (i32, i32, i32) {
    %c0_i32 = arith.constant 0 : i32
    %c0_i32_0 = arith.constant 0 : i32
    return %arg1, %c0_i32, %arg0 : i32, i32, i32
  }
}

</mosaic_0001>

<bundles_post_ra>
// kernel: tpu_custom_call.1
= control target key start
LH: loop header
LB: loop body
LE: loop exit
PB: predicated region body
PF: predicated region fallthrough
CT: control target
= control target key end

     0   :  { %10 = vsyncpa [#allocation3], 0  ;;  %s4378_s0 = inlined_call_operand.vmem [shape: bf16[2,4,150,4], index: 0, kind: input, shape index: {}]   ;;  %s4379_s1 = inlined_call_operand.vmem [shape: bf16[9,4,128], index: 1, kind: input, shape index: {}]   ;;  %s4380_s2 = inlined_call_operand.hbm [shape: bf16[2,120,128], index: 2, kind: output, shape index: {0}]   ;;  %s4381_s3 = inlined_call_operand.hbm [shape: f32[2,1,128], index: 3, kind: output, shape index: {1}]   ;;  %s4382_s4 = inlined_call_operand.hbm [shape: f32[2,1,128], index: 4, kind: output, shape index: {2}]  }
   0x1   :  { %12 = vsyncpa [#allocation3 + $0x1], 0 }
   0x2   :  { %13 = vsyncpa [#allocation5], 0 }
   0x3   :  { %15 = vsyncpa [#allocation5 + $0x1], 0  ;;  %s3424_s15 = smov 0   ;;  %s3426_s16 = smov 0  }
   0x4   :  { %s3428_s17 = smov 0   ;;  %s3430_s18 = smov 0  }
   0x5   :  { %s3432_s19 = smov 0   ;;  %s3434_s20 = smov 0  }
   0x6 LB: > { %s2632_s21 = sadd.s32 4294967295, %s3394_s20   ;;  %s2633_s22 = sadd.s32 4294967294, %s3394_s20   ;;  %s3394_s20 = sphi %s3434_s20, %s21_s20   ;;  %s3390_s19 = sphi %s3432_s19, %s4435_s19   ;;  %s3386_s18 = sphi %s3430_s18, %s4434_s18   ;;  %s3382_s17 = sphi %s3428_s17, %s4433_s17   ;;  %s3378_s16 = sphi %s3426_s16, %s4432_s16   ;;  %s3374_s15 = sphi %s3424_s15, %s4431_s15  }
   0x7   : > { %s30_s23 = sadd.s32 1, %s3390_s19  ;;  %s94_s24 = sadd.s32 1, %s3382_s17 }
   0x8   : > { %p31_p0 = scmp.ge.s32.totalorder %s30_s23, 2  ;;  %p104_p1 = scmp.ne.s32.totalorder %s3382_s17, %s3378_s16 }
   0x9   : > { %p105_p2 = scmp.eq.s32.totalorder %s2632_s21, 1  ;;  %p110_p3 = scmp.ne.s32.totalorder %s3378_s16, %s3374_s15 }
   0xa   : > { %s4437_s23 = smov (%p31_p0, %s30_s23), 0  ;;  %p111_p5 = scmp.eq.s32.totalorder %s2633_s22, 1 }
   0xb   : > { %p3466_p4 = por %p105_p2, %p104_p1  ;;  %s89_s26 = ssub.s32 %s3390_s19, %s4437_s23 }
   0xc   : > { %p2637_p6 = scmp.ge.s32.totalorder %s3394_s20, 1  ;;  %p92_p7 = scmp.eq.s32.totalorder %s89_s26, 0 }
   0xd   : > { %p3475_p8 = por %p111_p5, %p110_p3  ;;  %p200_p9 = scmp.lt.s32.totalorder %s3394_s20, 3 }
   0xe   : > { %s3481_s28 = scalar_select %p92_p7, %s3382_s17, %s94_s24  }
   0xf   : > { %p201_p10 = pnand %p2637_p6, %p200_p9 }
  0x10   : > { %p238_p11 = scmp.lt.s32.totalorder (!%p201_p10), %s3386_s18, 1  ;;  %s3938_s12 = sand.u32 (!%p201_p10), 1, %s3378_s16  }
  0x11   : > { %204 = sbr.rel (%p201_p10) target bundleno = 476 (0x1dc), region = 28  ;;  %s2438_s7 = scalar_lea.sflag (!%p201_p10), [#allocation3], %s3938_s12 }
  0x12   : > { %s3185_s13 = smul.u32 (!%p201_p10), 60, %s3938_s12 }
  0x13   : > { %s3187_s24 = smul.u32 (!%p201_p10), 60, %s3386_s18 }
  0x15   : > { %s2458_s30 = scalar_lea.hbm (!%p201_p10), %s4380_s2, %s3187_s24 }
  0x16   : > { %v2654_v0 = vld [vmem:[%s4379_s1 + $0x2] sm:$0x3]  ;;  %vm345_vm0 = vcmask 1041408   ;;  %v2727_v2 = vld [vmem:[%s4379_s1 + $0x4] sm:$0x3]  ;;  %s239_s9 = scalar_select %p238_p11, %s3386_s18, 1 }
  0x17   : > { %v347_v1 = vsel %vm345_vm0, %v2654_v0, 0  ;;  %v2783_v3 = vld [vmem:[%s4379_s1 + $0x6] sm:$0x3]  ;;  %v657_v4 = vsel %vm345_vm0, %v2727_v2, 0  ;;  %v263_v6 = vld [vmem:[%s4379_s1] sm:$0x3] }
  0x18   : > { %3169 = vmatpush.bf16.msra.mxu1 %v347_v1  ;;  %3170 = vmatpush.bf16.msra.mxu2 %v347_v1  ;;  %v803_v5 = vsel %vm345_vm0, %v2783_v3, 0  ;;  %v460_v7 = vsel %vm345_vm0, %v263_v6, 0  ;;  %v2835_v8 = vld [vmem:[%s4379_s1 + $0x8] sm:$0x3]  ;;  %s3186_s14 = smul.u32 304, %s239_s9  ;;  %vm320_vm1 = vcmask 31744  }
  0x19   : > { %3171 = vmatpush.bf16.msra.mxu3 %v347_v1  ;;  %356 = vmatpush.bf16.msra.mxu0 %v347_v1  ;;  %v949_v9 = vsel %vm345_vm0, %v2835_v8, 0  ;;  %v2929_v14 = vld [vmem:[%s4379_s1 + $0xc] sm:$0x3]  ;;  %v2954_v15 = vld [vmem:[%s4379_s1 + $0xe] sm:$0x3]  ;;  %s2461_s6 = sshll.u32 %s2458_s30, 4  ;;  %s2462_s6 = int_to_ptr.hbm [resolvable:$true] %s2461_s6 }
  0x1a   : > { %s3508_s29 = scalar_lea.vmem %s4378_s0, %s3186_s14  ;;  %v2888_v16 = vld [vmem:[%s4379_s1 + $0xa] sm:$0x3]  ;;  %v1380_v17 = vsel %vm345_vm0, %v2929_v14, 0  ;;  %v1599_v18 = vsel %vm345_vm0, %v2954_v15, 0  ;;  %v2995_v20 = vld [vmem:[%s4379_s1 + $0x10] sm:$0x3] }
  0x1b   : > { %v3016_v10 = vld [vmem:[%s3508_s29 + $0x5c] sm:$0xff]  ;;  %v3018_v11 = vld [vmem:[%s3508_s29 + $0x6c] sm:$0xff]  ;;  %v1160_v19 = vsel %vm345_vm0, %v2888_v16, 0  ;;  %v1699_v21 = vsel %vm345_vm0, %v2995_v20, 0  ;;  %v2653_v22 = vld [vmem:[%s3508_s29 + $0x84] sm:$0xf] }
  0x1c   : > { %666 = vmatpush.bf16.msrb.mxu2 %v657_v4  ;;  %469 = vmatpush.bf16.msrb.mxu1 %v460_v7  ;;  %v3020_v12 = vld [vmem:[%s3508_s29 + $0x7c] sm:$0xff]  ;;  %v3014_v13 = vld [vmem:[%s3508_s29 + $0x4c] sm:$0xff]  ;;  %v311_v23 = vunpack.c.l.b16 %v2653_v22  ;;  %v3017_v24 = vld [vmem:[%s3508_s29 + $0x64] sm:$0xff]  ;;  %vm568_vm2 = vsmask.f32 7424  ;;  %s3992_s14 = scalar_lea.vmem [#allocation2], %s3185_s13 }
  0x1d   : > { %812 = vmatpush.bf16.msrb.mxu3 %v803_v5  ;;  %958 = vmatpush.bf16.msrb.mxu0 %v949_v9  ;;  %v3019_v25 = vld [vmem:[%s3508_s29 + $0x74] sm:$0xff]  ;;  %v3021_v28 = vld [vmem:[%s3508_s29] sm:$0xff]  ;;  %v3022_v29 = vld [vmem:[%s3508_s29 + $0x8] sm:$0xff]  ;;  %vm1283_vm3 = vsmask.f32 4352  ;;  %s2459_s5 = sshll.u32 %s3992_s14, 4  ;;  %s4286_s5 = int_to_ptr.vmem [resolvable:$true] %s2459_s5 }
  0x1e   : > { %2685 = vmatmul.msk.bf16.vlgmr.msra.gmra.mxu1 %vm320_vm1, %v3016_v10  ;;  %2687 = vmatmul.msk.bf16.vlgmr.msra.gmra.mxu2 %vm320_vm1, %v3018_v11  ;;  %v319_v26 = vpack.c.b16 %v311_v23, %v311_v23  ;;  %v3015_v27 = vld [vmem:[%s3508_s29 + $0x54] sm:$0xff]  ;;  %v572_v30 = vshll.u32 %v3021_v28, 16  ;;  %v570_v31 = vshrl.u32 %v3021_v28, 16  ;;  %v577_v33 = vshll.u32 %v3022_v29, 16  ;;  %v3007_v36 = vld [vmem:[%s3508_s29] sm:$0xff]  ;;  %v3008_v45 = vld [vmem:[%s3508_s29 + $0x8] sm:$0xff] }
  0x1f   : > { %2689 = vmatmul.msk.bf16.vlgmr.msra.gmra.mxu3 %vm320_vm1, %v3020_v12  ;;  %2683 = vmatmul.msk.bf16.vlgmr.msra.gmra.mxu0 %vm320_vm1, %v3014_v13  ;;  %v3029_v38 = vld [vmem:[%s3508_s29 + $0x98] sm:$0xff]  ;;  %v3036_v39 = vld [vmem:[%s3508_s29 + $0xe4] sm:$0xff]  ;;  %v3023_v40 = vld [vmem:[%s3508_s29 + $0x10] sm:$0xff]  ;;  %v581_v41 = vshrl.u32 %v3022_v29, 16  ;;  %s3270_s8 = sshra.s32 %s2462_s6, 4  ;;  %s3276_s13 = scalar_lea.hbm %s4380_s2, 120  ;;  %s3271_s8 = int_to_ptr.hbm [resolvable:$true] %s3270_s8 }
  0x20   : > { %1389 = vmatpush.bf16.msra.mxu2 %v1380_v17  ;;  %1169 = vmatpush.bf16.msra.mxu1 %v1160_v19  ;;  %v574_v32 = vrot.slane %v572_v30, 1  ;;  %v579_v35 = vrot.slane %v577_v33, 1  ;;  %v585_v42 = vshll.u32 %v3023_v40, 16  ;;  %v3030_v47 = vld [vmem:[%s3508_s29 + $0xa0] sm:$0xff]  ;;  %v3037_v48 = vld [vmem:[%s3508_s29 + $0xec] sm:$0xff]  ;;  %v3024_v49 = vld [vmem:[%s3508_s29 + $0x18] sm:$0xff]  ;;  %p3277_p1 = scmp.lt.s32.totalorder %s3271_s8, %s4380_s2 }
  0x21   : > { %1608 = vmatpush.bf16.msra.mxu3 %v1599_v18  ;;  %1708 = vmatpush.bf16.msra.mxu0 %v1699_v21  ;;  %v589_v50 = vshrl.u32 %v3023_v40, 16  ;;  %v593_v51 = vshll.u32 %v3024_v49, 16  ;;  %v3009_v54 = vld [vmem:[%s3508_s29 + $0x10] sm:$0xff]  ;;  %v3031_v56 = vld [vmem:[%s3508_s29 + $0xa8] sm:$0xff]  ;;  %v3025_v58 = vld [vmem:[%s3508_s29 + $0x20] sm:$0xff]  ;;  %v597_v59 = vshrl.u32 %v3024_v49, 16 }
  0x22   : > { %v575_v34 = vor.u32 %v574_v32, %v570_v31  ;;  %v583_v43 = vor.u32 %v581_v41, %v579_v35  ;;  %v587_v44 = vrot.slane %v585_v42, 1  ;;  %v3038_v57 = vld [vmem:[%s3508_s29 + $0xf4] sm:$0xff]  ;;  %v601_v60 = vshll.u32 %v3025_v58, 16  ;;  %v3039_v2 = vld [vmem:[%s3508_s29 + $0xfc] sm:$0xff]  ;;  %v3026_v3 = vld [vmem:[%s3508_s29 + $0x28] sm:$0xff]  ;;  %s3272_s9 = scalar_lea.hbm %s3271_s8, 60 }
  0x23   : > { %v595_v53 = vrot.slane %v593_v51, 1  ;;  %v3010_v63 = vld [vmem:[%s3508_s29 + $0x18] sm:$0xff]  ;;  %v3032_v1 = vld [vmem:[%s3508_s29 + $0xb0] sm:$0xff]  ;;  %v605_v4 = vshrl.u32 %v3025_v58, 16  ;;  %v609_v5 = vshll.u32 %v3026_v3, 16  ;;  %v3011_v8 = vld [vmem:[%s3508_s29 + $0x20] sm:$0xff]  ;;  %p3273_p12 = scmp.ne.s32.totalorder %s3271_s8, %s3272_s9  ;;  %p3278_p2 = scmp.lt.s32.totalorder %s3276_s13, %s3272_s9 }
  0x24   : > { %v580_v37 = vsel %vm568_vm2, %v575_v34, %v579_v35  ;;  %v588_v46 = vsel %vm568_vm2, %v583_v43, %v587_v44  ;;  %v591_v52 = vor.u32 %v589_v50, %v587_v44  ;;  %v603_v62 = vrot.slane %v601_v60, 1  ;;  %v3033_v10 = vld [vmem:[%s3508_s29 + $0xb8] sm:$0xff]  ;;  %v3040_v11 = vld [vmem:[%s3508_s29 + $0x104] sm:$0xff]  ;;  %v3027_v12 = vld [vmem:[%s3508_s29 + $0x30] sm:$0xff] }
  0x25   : > { %v599_v61 = vor.u32 %v597_v59, %v595_v53  ;;  %v611_v7 = vrot.slane %v609_v5, 1  ;;  %v613_v13 = vshrl.u32 %v3026_v3, 16  ;;  %v617_v14 = vshll.u32 %v3027_v12, 16  ;;  %v3012_v17 = vld [vmem:[%s3508_s29 + $0x28] sm:$0xff]  ;;  %v3034_v19 = vld [vmem:[%s3508_s29 + $0xc0] sm:$0xff]  ;;  %v3013_v28 = vld [vmem:[%s3508_s29 + $0x30] sm:$0xff]  ;;  %p3274_p13 = pnand %p3273_p12, %p3466_p4  ;;  %p3279_p3 = por %p3278_p2, %p3277_p1 }
  0x26   : > { %v596_v55 = vsel %vm568_vm2, %v591_v52, %v595_v53  ;;  %v607_v6 = vor.u32 %v605_v4, %v603_v62  ;;  %v3041_v20 = vld [vmem:[%s3508_s29 + $0x10c] sm:$0xff]  ;;  %v2758_v21 = vld [vmem:[%s3508_s29 + $0x38] sm:$0xf]  ;;  %v3028_v22 = vld [vmem:[%s3508_s29 + $0x38] sm:$0x10] }
  0x27   : > { %v604_v0 = vsel %vm568_vm2, %v599_v61, %v603_v62  ;;  %v615_v15 = vor.u32 %v613_v13, %v611_v7  ;;  %v619_v16 = vrot.slane %v617_v14, 1  ;;  %v2759_v23 = vor.u32 %v3028_v22, %v2758_v21  ;;  %v3035_v31 = vld [vmem:[%s3508_s29 + $0xc8] sm:$0xff]  ;;  %v3042_v32 = vld [vmem:[%s3508_s29 + $0x114] sm:$0xff]  ;;  %v2834_v40 = vld [vmem:[%s3508_s29 + $0x11c] sm:$0xf]  ;;  %p3275_p0 = pneg %p3274_p13 }
  0x28   : > { %v612_v9 = vsel %vm568_vm2, %v607_v6, %v611_v7  ;;  %v915_v44 = vunpack.c.l.b16 %v2834_v40  ;;  %v3051_v49 = vld [vmem:[%s3508_s29 + $0x50] sm:$0xf0]  ;;  %v3043_v53 = vld [vmem:[%s3508_s29 + $0x98] sm:$0xff]  ;;  %v3640_v62 = vld [vmem:[%s3508_s29 + $0xa0] sm:$0xff] }
  0x29   : > { %v620_v18 = vsel %vm568_vm2, %v615_v15, %v619_v16  ;;  %v629_v42 = vshrl.u32 %v2759_v23, 16  ;;  %v3052_v60 = vld [vmem:[%s3508_s29 + $0x58] sm:$0xff]  ;;  %p3280_p5 = pnand %p3279_p3, %p3275_p0 }
  0x2a   : > { %v1512_v6 = vshrl.u32 %v3052_v60, 16  ;;  %v1515_v7 = vshll.u32 %v3052_v60, 16  ;;  %v3177_v40 = vld [vmem:[%s3508_s29 + $0x14] sm:$0xff]  }
  0x2c   : > { %v1514_v21 = vrot.slane %v1512_v6, 3  ;;  %v1517_v22 = vrot.slane %v1515_v7, 4 }
  0x2e   : > { %2686 = vmatmul.msk.bf16.gmra.mxu1 %vm320_vm1, %v3017_v24  ;;  %2688 = vmatmul.msk.bf16.gmra.mxu2 %vm320_vm1, %v3019_v25  ;;  %v621_v24 = vshrl.u32 %v3027_v12, 16  ;;  %v625_v25 = vshll.u32 %v2759_v23, 16  ;;  %v1080_v12 = vshll.u32 %v3640_v62, 16 }
  0x2f   : > { %2690 = vmatmul.msk.bf16.gmra.mxu3 %vm320_vm1, %v319_v26  ;;  %2684 = vmatmul.msk.bf16.gmra.mxu0 %vm320_vm1, %v3015_v27 }
  0x30   : > { %v623_v26 = vor.u32 %v621_v24, %v619_v16  ;;  %v627_v27 = vrot.slane %v625_v25, 1  ;;  %v1082_v24 = vrot.slane %v1080_v12, 1 }
  0x32   : > { %v628_v30 = vsel %vm568_vm2, %v623_v26, %v627_v27  ;;  %v631_v52 = vor.u32 %v629_v42, %v627_v27 }
  0x3e   : > { %2719 = vmatmul.msk.bf16.vlgmr.msrb.gmra.mxu1 %vm320_vm1, %v3007_v36  ;;  %2760 = vmatmul.msk.bf16.vlgmr.msrb.gmra.mxu2 %vm320_vm1, %v580_v37  ;;  %v262_v37 = vld [vmem:[%s3508_s29 + $0x38] sm:$0xf] }
  0x3f   : > { %2812 = vmatmul.msk.bf16.vlgmr.msrb.gmra.mxu3 %vm320_vm1, %v3029_v38  ;;  %2864 = vmatmul.msk.bf16.vlgmr.msrb.gmra.mxu0 %vm320_vm1, %v3036_v39  ;;  %v2782_v39 = vld [vmem:[%s3508_s29 + $0xd0] sm:$0xf]  ;;  %v426_v41 = vunpack.c.l.b16 %v262_v37 }
  0x40   : > { %v769_v43 = vunpack.c.l.b16 %v2782_v39 }
  0x41   : > { %v434_v51 = vpack.c.b16 %v426_v41, %v426_v41 }
  0x4e   : > { %2720 = vmatmul.msk.bf16.gmra.mxu1 %vm320_vm1, %v3008_v45  ;;  %2761 = vmatmul.msk.bf16.gmra.mxu2 %vm320_vm1, %v588_v46  ;;  %v3137_v45 = vld [vmem:[%s3508_s29 + $0x4] sm:$0x8]  ;;  %v3173_v46 = vld [vmem:[%s3508_s29 + $0x4] sm:$0xf0]  }
  0x4f   : > { %2813 = vmatmul.msk.bf16.gmra.mxu3 %vm320_vm1, %v3030_v47  ;;  %2865 = vmatmul.msk.bf16.gmra.mxu0 %vm320_vm1, %v3037_v48  ;;  %v2957_v48 = vld [vmem:[%s3508_s29 + $0x50] sm:$0x8]  ;;  %v3138_v58 = vor.u32 %v3173_v46, %v3137_v45  ;;  %v3053_v45 = vld [vmem:[%s3508_s29 + $0x60] sm:$0xff]  ;;  %v3045_v46 = vld [vmem:[%s3508_s29 + $0xa8] sm:$0xff] }
  0x50   : > { %v2958_v61 = vor.u32 %v3051_v49, %v2957_v48  ;;  %v1302_v48 = vshrl.u32 %v3177_v40, 16  ;;  %v1305_v49 = vshll.u32 %v3177_v40, 16  ;;  %v1092_v40 = vshrl.u32 %v3045_v46, 16 }
  0x52   : > { %v1504_v4 = vshrl.u32 %v2958_v61, 16  ;;  %v1507_v5 = vshll.u32 %v2958_v61, 16  ;;  %v1304_v60 = vrot.slane %v1302_v48, 3  ;;  %v1307_v61 = vrot.slane %v1305_v49, 4 }
  0x54   : > { %v1308_v7 = vor.u32 %v1307_v61, %v1304_v60 }
  0x5e   : > { %2721 = vmatmul.msk.bf16.gmra.mxu1 %vm320_vm1, %v3009_v54  ;;  %2762 = vmatmul.msk.bf16.gmra.mxu2 %vm320_vm1, %v596_v55  ;;  %v777_v55 = vpack.c.b16 %v769_v43, %v769_v43 }
  0x5f   : > { %2814 = vmatmul.msk.bf16.gmra.mxu3 %vm320_vm1, %v3031_v56  ;;  %2866 = vmatmul.msk.bf16.gmra.mxu0 %vm320_vm1, %v3038_v57  ;;  %v923_v56 = vpack.c.b16 %v915_v44, %v915_v44  ;;  %v3175_v57 = vld [vmem:[%s3508_s29 + $0xc] sm:$0xff]  }
  0x60   : > { %v1296_v3 = vshll.u32 %v3175_v57, 16  ;;  %v3122_v44 = vld [vmem:[%s3508_s29 + $0x8] sm:$0xff]  }
  0x6e   : > { %2722 = vmatmul.msk.bf16.gmra.mxu1 %vm320_vm1, %v3010_v63  ;;  %2763 = vmatmul.msk.bf16.gmra.mxu2 %vm320_vm1, %v604_v0  ;;  %v1075_v63 = vshll.u32 %v3043_v53, 16  ;;  %v1285_v0 = vshrl.u32 %v3138_v58, 16 }
  0x6f   : > { %2815 = vmatmul.msk.bf16.gmra.mxu3 %vm320_vm1, %v3032_v1  ;;  %2867 = vmatmul.msk.bf16.gmra.mxu0 %vm320_vm1, %v3039_v2  ;;  %v1288_v1 = vshll.u32 %v3138_v58, 16  ;;  %v1293_v2 = vshrl.u32 %v3175_v57, 16  ;;  %v1084_v57 = vshrl.u32 %v3640_v62, 16  ;;  %v1088_v58 = vshll.u32 %v3045_v46, 16 }
  0x70   : > { %v1287_v14 = vrot.slane %v1285_v0, 3 }
  0x71   : > { %v1290_v15 = vrot.slane %v1288_v1, 4  ;;  %v1295_v16 = vrot.slane %v1293_v2, 3  ;;  %v1090_v6 = vrot.slane %v1088_v58, 1 }
  0x73   : > { %v1291_v25 = vor.u32 %v1290_v15, %v1287_v14 }
  0x7e   : > { %2723 = vmatmul.msk.bf16.gmra.mxu1 %vm320_vm1, %v3011_v8  ;;  %2764 = vmatmul.msk.bf16.gmra.mxu2 %vm320_vm1, %v612_v9 }
  0x7f   : > { %2816 = vmatmul.msk.bf16.gmra.mxu3 %vm320_vm1, %v3033_v10  ;;  %2868 = vmatmul.msk.bf16.gmra.mxu0 %vm320_vm1, %v3040_v11  ;;  %v1073_v10 = vshrl.u32 %v3043_v53, 16  ;;  %v1077_v11 = vrot.slane %v1075_v63, 1 }
  0x81   : > { %v1078_v23 = vor.u32 %v1077_v11, %v1073_v10 }
  0x83   : > { %v1083_v37 = vsel %vm568_vm2, %v1078_v23, %v1082_v24  ;;  %v3054_v23 = vld [vmem:[%s3508_s29 + $0x68] sm:$0xff] }
  0x8e   : > { %2724 = vmatmul.msk.bf16.gmra.mxu1 %vm320_vm1, %v3012_v17  ;;  %2765 = vmatmul.msk.bf16.gmra.mxu2 %vm320_vm1, %v620_v18  ;;  %v1298_v17 = vrot.slane %v1296_v3, 4 }
  0x8f   : > { %2817 = vmatmul.msk.bf16.gmra.mxu3 %vm320_vm1, %v3034_v19  ;;  %2869 = vmatmul.msk.bf16.gmra.mxu0 %vm320_vm1, %v3041_v20  ;;  %v1506_v19 = vrot.slane %v1504_v4, 3  ;;  %v1509_v20 = vrot.slane %v1507_v5, 4  ;;  %v1086_v5 = vor.u32 %v1084_v57, %v1082_v24 }
  0x90   : > { %v1299_v26 = vor.u32 %v1298_v17, %v1295_v16  ;;  %v3179_v16 = vld [vmem:[%s3508_s29 + $0x1c] sm:$0xff]  }
  0x91   : > { %v1510_v27 = vor.u32 %v1509_v20, %v1506_v19  ;;  %v1091_v15 = vsel %vm568_vm2, %v1086_v5, %v1090_v6  ;;  %v3124_v5 = vld [vmem:[%s3508_s29 + $0x18] sm:$0xff]  }
  0x92   : > { %v1300_v39 = vsel %vm1283_vm3, %v1291_v25, %v1299_v26  ;;  %v3046_v25 = vld [vmem:[%s3508_s29 + $0xb0] sm:$0xff] }
  0x9b   : > { %v3600_v29 = vpop.f32.mrf.mxu1 }
  0x9c   : > { %v3605_v33 = vpop.f32.mrf.mxu0 }
  0x9e   : > { %2725 = vmatmul.msk.bf16.gmra.mxu1 %vm320_vm1, %v3013_v28  ;;  %2766 = vmatmul.msk.bf16.gmra.mxu2 %vm320_vm1, %v628_v30  ;;  %v1518_v28 = vor.u32 %v1517_v22, %v1514_v21  ;;  %v3123_v22 = vld [vmem:[%s3508_s29 + $0x10] sm:$0xff]  }
  0x9f   : > { %2818 = vmatmul.msk.bf16.gmra.mxu3 %vm320_vm1, %v3035_v31  ;;  %2870 = vmatmul.msk.bf16.gmra.mxu0 %vm320_vm1, %v3042_v32 }
  0xa0   : > { %v1519_v43 = vsel %vm1283_vm3, %v1510_v27, %v1518_v28  ;;  %v1314_v27 = vshll.u32 %v3179_v16, 16 }
  0xa1   : > { %v3611_v34 = vpop.f32.mrf.mxu2 }
  0xa2   : > { %v3613_v35 = vpop.f32.mrf.mxu3 }
  0xa3   : > { %v3615_v36 = vpop.f32.mrf.mxu1 }
  0xa4   : > { %v3618_v38 = vpop.f32.mrf.mxu0 }
  0xa9   : > { %v3624_v47 = vpop.f32.mrf.mxu2 }
  0xaa   : > { %v3628_v50 = vpop.f32.mrf.mxu3 }
  0xab   : > { %v3631_v54 = vpop.f32.mrf.mxu1 }
  0xac   : > { %v3634_v59 = vpop.f32.mrf.mxu0 }
  0xae   : > { %2726 = vmatmul.msk.bf16.gmra.mxu1 %vm320_vm1, %v434_v51  ;;  %2767 = vmatmul.msk.bf16.gmra.mxu2 %vm320_vm1, %v631_v52  ;;  %v1521_v51 = vshrl.u32 %v3053_v45, 16  ;;  %v1524_v52 = vshll.u32 %v3053_v45, 16 }
  0xaf   : > { %2819 = vmatmul.msk.bf16.gmra.mxu3 %vm320_vm1, %v777_v55  ;;  %2871 = vmatmul.msk.bf16.gmra.mxu0 %vm320_vm1, %v923_v56 }
  0xb0   : > { %v1523_v2 = vrot.slane %v1521_v51, 3  ;;  %v1526_v3 = vrot.slane %v1524_v52, 4 }
  0xb1   : > { %v3644_v8 = vpop.f32.mrf.mxu2 }
  0xb2   : > { %v3646_v9 = vpop.f32.mrf.mxu3  ;;  %v1527_v10 = vor.u32 %v1526_v3, %v1523_v2 }
  0xb3   : > { %v3649_v13 = vpop.f32.mrf.mxu1 }
  0xb4   : > { %v3651_v18 = vpop.f32.mrf.mxu0  ;;  %v1528_v21 = vsel %vm1283_vm3, %v1518_v28, %v1527_v10 }
  0xb9   : > { %v3653_v30 = vpop.f32.mrf.mxu2 }
  0xba   : > { %v395_v31 = vpop.f32.mrf.mxu3 }
  0xbb   : > { %v471_v32 = vpop.f32.mrf.mxu1  ;;  %v1530_v31 = vshrl.u32 %v3054_v23, 16 }
  0xbc   : > { %v472_v41 = vadd.f32 %v471_v32, %v3605_v33  ;;  %v960_v42 = vpop.f32.mrf.mxu0 }
  0xbd   : > { %v1532_v49 = vrot.slane %v1530_v31, 3 }
  0xbe   : > { %2921 = vmatmul.msk.bf16.vlgmr.msra.gmra.mxu1 %vm320_vm1, %v1083_v37  ;;  %2930 = vmatmul.msk.bf16.vlgmr.msra.gmra.mxu2 %vm320_vm1, %v1300_v39 }
  0xbf   : > { %2987 = vmatmul.msk.bf16.vlgmr.msra.gmra.mxu3 %vm320_vm1, %v1519_v43  ;;  %2996 = vmatmul.msk.bf16.vlgmr.msra.gmra.mxu0 %vm320_vm1, %v3122_v44  ;;  %v1316_v43 = vrot.slane %v1314_v27, 4 }
  0xc1   : > { %v668_v53 = vpop.f32.mrf.mxu2 }
  0xc2   : > { %v707_v33 = vadd.f32 %v668_v53, %v472_v41  ;;  %v814_v55 = vpop.f32.mrf.mxu3  ;;  %v1096_v41 = vshll.u32 %v3046_v25, 16  ;;  %v1094_v53 = vor.u32 %v1092_v40, %v1090_v6  ;;  %v3055_v6 = vld [vmem:[%s3508_s29 + $0x70] sm:$0xff] }
  0xc3   : > { %v473_v56 = vpop.f32.mrf.mxu1 }
  0xc4   : > { %v853_v63 = vadd.f32 %v814_v55, %v707_v33  ;;  %v474_v0 = vadd.f32 %v473_v56, %v3618_v38  ;;  %v962_v1 = vpop.f32.mrf.mxu0  ;;  %v1309_v38 = vsel %vm1283_vm3, %v1299_v26, %v1308_v7  ;;  %v1311_v26 = vshrl.u32 %v3179_v16, 16 }
  0xc5   : > { %v1098_v33 = vrot.slane %v1096_v41, 1 }
  0xc6   : > { %v3669_v4 = vadd.f32 %v960_v42, %v853_v63  ;;  %v1313_v42 = vrot.slane %v1311_v26, 3  ;;  %v3181_v63 = vld [vmem:[%s3508_s29 + $0x24] sm:$0xff]  }
  0xc7   : > { %v1099_v61 = vsel %vm568_vm2, %v1094_v53, %v1098_v33  ;;  %v3125_v53 = vld [vmem:[%s3508_s29 + $0x20] sm:$0xff]  }
  0xc8   : > { %v1317_v55 = vor.u32 %v1316_v43, %v1313_v42 }
  0xc9   : > { %v670_v11 = vpop.f32.mrf.mxu2 }
  0xca   : > { %v708_v62 = vadd.f32 %v670_v11, %v474_v0  ;;  %v816_v12 = vpop.f32.mrf.mxu3 }
  0xcb   : > { %v476_v14 = vpop.f32.mrf.mxu1 }
  0xcc   : > { %v854_v17 = vadd.f32 %v816_v12, %v708_v62  ;;  %v477_v19 = vadd.f32 %v476_v14, %v3634_v59  ;;  %v965_v20 = vpop.f32.mrf.mxu0  ;;  %v1533_v59 = vshll.u32 %v3054_v23, 16  ;;  %v1320_v62 = vshrl.u32 %v3181_v63, 16 }
  0xcd   : > { %v1323_v12 = vshll.u32 %v3181_v63, 16  ;;  %v1539_v14 = vshrl.u32 %v3055_v6, 16 }
  0xce   : > { %2922 = vmatmul.msk.bf16.gmra.mxu1 %vm320_vm1, %v1091_v15  ;;  %2931 = vmatmul.msk.bf16.gmra.mxu2 %vm320_vm1, %v1309_v38  ;;  %v3680_v24 = vadd.f32 %v962_v1, %v854_v17  ;;  %v1535_v51 = vrot.slane %v1533_v59, 4  ;;  %v1100_v17 = vshrl.u32 %v3046_v25, 16 }
  0xcf   : > { %2988 = vmatmul.msk.bf16.gmra.mxu3 %vm320_vm1, %v1528_v21  ;;  %2997 = vmatmul.msk.bf16.gmra.mxu0 %vm320_vm1, %v3123_v22  ;;  %v1325_v21 = vrot.slane %v1323_v12, 4  ;;  %v1541_v27 = vrot.slane %v1539_v14, 3 }
  0xd0   : > { %v1536_v56 = vor.u32 %v1535_v51, %v1532_v49 }
  0xd1   : > { %v673_v32 = vpop.f32.mrf.mxu2 }
  0xd2   : > { %v709_v37 = vadd.f32 %v673_v32, %v477_v19  ;;  %v819_v28 = vpop.f32.mrf.mxu3  ;;  %v1537_v3 = vsel %vm1283_vm3, %v1527_v10, %v1536_v56  ;;  %v1102_v32 = vor.u32 %v1100_v17, %v1098_v33  ;;  %v3056_v33 = vld [vmem:[%s3508_s29 + $0x78] sm:$0xff] }
  0xd3   : > { %v478_v39 = vpop.f32.mrf.mxu1 }
  0xd4   : > { %v855_v44 = vadd.f32 %v819_v28, %v709_v37  ;;  %v479_v45 = vadd.f32 %v478_v39, %v3651_v18  ;;  %v967_v48 = vpop.f32.mrf.mxu0  ;;  %v1318_v18 = vsel %vm1283_vm3, %v1308_v7, %v1317_v55  ;;  %v3047_v7 = vld [vmem:[%s3508_s29 + $0xb8] sm:$0xff] }
  0xd5   : > { %v1104_v19 = vshll.u32 %v3047_v7, 16 }
  0xd6   : > { %v3686_v52 = vadd.f32 %v965_v20, %v855_v44  ;;  %v1322_v20 = vrot.slane %v1320_v62, 3  ;;  %v3183_v44 = vld [vmem:[%s3508_s29 + $0x2c] sm:$0xff]  }
  0xd7   : > { %v1106_v37 = vrot.slane %v1104_v19, 1 }
  0xd8   : > { %v1326_v28 = vor.u32 %v1325_v21, %v1322_v20 }
  0xd9   : > { %v675_v57 = vpop.f32.mrf.mxu2  ;;  %v1107_v43 = vsel %vm568_vm2, %v1102_v32, %v1106_v37  ;;  %v3057_v32 = vld [vmem:[%s3508_s29 + $0x80] sm:$0xff] }
  0xda   : > { %v710_v46 = vadd.f32 %v675_v57, %v479_v45  ;;  %v821_v58 = vpop.f32.mrf.mxu3 }
  0xdb   : > { %v481_v60 = vpop.f32.mrf.mxu1 }
  0xdc   : > { %v856_v0 = vadd.f32 %v821_v58, %v710_v46  ;;  %v482_v1 = vadd.f32 %v481_v60, %v3600_v29  ;;  %v970_v2 = vpop.f32.mrf.mxu0  ;;  %v1542_v29 = vshll.u32 %v3055_v6, 16  ;;  %v1329_v46 = vshrl.u32 %v3183_v44, 16 }
  0xdd   : > { %v1332_v58 = vshll.u32 %v3183_v44, 16  ;;  %v1551_v60 = vshll.u32 %v3056_v33, 16 }
  0xde   : > { %2923 = vmatmul.msk.bf16.gmra.mxu1 %vm320_vm1, %v1099_v61  ;;  %2932 = vmatmul.msk.bf16.gmra.mxu2 %vm320_vm1, %v1318_v18  ;;  %v3697_v11 = vadd.f32 %v967_v48, %v856_v0  ;;  %v1544_v31 = vrot.slane %v1542_v29, 4  ;;  %v1108_v0 = vshrl.u32 %v3047_v7, 16 }
  0xdf   : > { %2989 = vmatmul.msk.bf16.gmra.mxu3 %vm320_vm1, %v1537_v3  ;;  %2998 = vmatmul.msk.bf16.gmra.mxu0 %vm320_vm1, %v3124_v5  ;;  %v1334_v3 = vrot.slane %v1332_v58, 4  ;;  %v1553_v14 = vrot.slane %v1551_v60, 4 }
  0xe0   : > { %v1545_v39 = vor.u32 %v1544_v31, %v1541_v27  ;;  %v3126_v31 = vld [vmem:[%s3508_s29 + $0x28] sm:$0xff]  }
  0xe1   : > { %v678_v15 = vpop.f32.mrf.mxu2 }
  0xe2   : > { %v711_v38 = vadd.f32 %v678_v15, %v482_v1  ;;  %v824_v10 = vpop.f32.mrf.mxu3  ;;  %v1546_v51 = vsel %vm1283_vm3, %v1536_v56, %v1545_v39  ;;  %v1110_v15 = vor.u32 %v1108_v0, %v1106_v37 }
  0xe3   : > { %v483_v16 = vpop.f32.mrf.mxu1 }
  0xe4   : > { %v857_v22 = vadd.f32 %v824_v10, %v711_v38  ;;  %v484_v23 = vadd.f32 %v483_v16, %v3615_v36  ;;  %v972_v26 = vpop.f32.mrf.mxu0  ;;  %v1327_v36 = vsel %vm1283_vm3, %v1317_v55, %v1326_v28  ;;  %v3719_v55 = vld [vmem:[%s3508_s29 + $0xc0] sm:$0xff] }
  0xe5   : > { %v1112_v1 = vshll.u32 %v3719_v55, 16 }
  0xe6   : > { %v3703_v59 = vadd.f32 %v970_v2, %v857_v22  ;;  %v1331_v2 = vrot.slane %v1329_v46, 3  ;;  %v3184_v22 = vld [vmem:[%s3508_s29 + $0x34] sm:$0xff]   ;;  %v1240_v46 = vld [vmem:[%s3508_s29 + $0x40] sm:$0xf] }
  0xe7   : > { %v1114_v38 = vrot.slane %v1112_v1, 1 }
  0xe8   : > { %v1335_v10 = vor.u32 %v1334_v3, %v1331_v2 }
  0xe9   : > { %v680_v40 = vpop.f32.mrf.mxu2  ;;  %v1115_v21 = vsel %vm568_vm2, %v1110_v15, %v1114_v38 }
  0xea   : > { %v712_v25 = vadd.f32 %v680_v40, %v484_v23  ;;  %v826_v41 = vpop.f32.mrf.mxu3  ;;  %v1338_v40 = vshrl.u32 %v3184_v22, 16 }
  0xeb   : > { %v486_v42 = vpop.f32.mrf.mxu1 }
  0xec   : > { %v858_v45 = vadd.f32 %v826_v41, %v712_v25  ;;  %v487_v48 = vadd.f32 %v486_v42, %v3631_v54  ;;  %v975_v49 = vpop.f32.mrf.mxu0  ;;  %v1548_v54 = vshrl.u32 %v3056_v33, 16  ;;  %v1341_v25 = vshll.u32 %v3184_v22, 16  ;;  %v3744_v33 = vld [vmem:[%s3508_s29 + $0x38] sm:$0xff]  }
  0xed   : > { %v1557_v41 = vshrl.u32 %v3057_v32, 16  ;;  %v1560_v42 = vshll.u32 %v3057_v32, 16 }
  0xee   : > { %2924 = vmatmul.msk.bf16.gmra.mxu1 %vm320_vm1, %v1107_v43  ;;  %2933 = vmatmul.msk.bf16.gmra.mxu2 %vm320_vm1, %v1327_v36  ;;  %v3714_v57 = vadd.f32 %v972_v26, %v858_v45  ;;  %v1550_v12 = vrot.slane %v1548_v54, 3  ;;  %v1116_v45 = vshrl.u32 %v3719_v55, 16 }
  0xef   : > { %2990 = vmatmul.msk.bf16.gmra.mxu3 %vm320_vm1, %v1546_v51  ;;  %2999 = vmatmul.msk.bf16.gmra.mxu0 %vm320_vm1, %v3125_v53  ;;  %v1340_v51 = vrot.slane %v1338_v40, 3  ;;  %v1343_v53 = vrot.slane %v1341_v25, 4  ;;  %v1562_v60 = vrot.slane %v1560_v42, 4 }
  0xf0   : > { %v1554_v16 = vor.u32 %v1553_v14, %v1550_v12  ;;  %v1118_v55 = vor.u32 %v1116_v45, %v1114_v38  ;;  %v3050_v12 = vld [vmem:[%s3508_s29 + $0xd0] sm:$0x10] }
  0xf1   : > { %v683_v61 = vpop.f32.mrf.mxu2  ;;  %v3752_v0 = vor.u32 %v1343_v53, %v1340_v51 }
  0xf2   : > { %v713_v56 = vadd.f32 %v683_v61, %v487_v48  ;;  %v829_v18 = vpop.f32.mrf.mxu3  ;;  %v1555_v27 = vsel %vm1283_vm3, %v1545_v39, %v1554_v16  ;;  %v3086_v61 = vunpack.c.h.b16 %v3744_v33 }
  0xf3   : > { %v488_v63 = vpop.f32.mrf.mxu1  ;;  %v1345_v38 = vsel %vm1283_vm3, %v1335_v10, %v3752_v0 }
  0xf4   : > { %v859_v5 = vadd.f32 %v829_v18, %v713_v56  ;;  %v489_v6 = vadd.f32 %v488_v63, %v3649_v13  ;;  %v977_v62 = vpop.f32.mrf.mxu0  ;;  %v1336_v13 = vsel %vm1283_vm3, %v1326_v28, %v1335_v10  ;;  %v3738_v28 = vld [vmem:[%s3508_s29 + $0xc8] sm:$0xff]  ;;  %v3748_v56 = vunpack.c.l.b16 %v1240_v46 }
  0xf5   : > { %v1124_v32 = vshrl.u32 %v3738_v28, 16 }
  0xf6   : > { %v3723_v29 = vadd.f32 %v975_v49, %v859_v5  ;;  %v1120_v49 = vshll.u32 %v3738_v28, 16  ;;  %v1282_v14 = vpack.c.b16 %v3748_v56, %v3086_v61 }
  0xf8   : > { %v1122_v63 = vrot.slane %v1120_v49, 1  ;;  %v1350_v10 = vshll.u32 %v1282_v14, 16 }
  0xf9   : > { %v685_v7 = vpop.f32.mrf.mxu2 }
  0xfa   : > { %v714_v17 = vadd.f32 %v685_v7, %v489_v6  ;;  %v831_v19 = vpop.f32.mrf.mxu3  ;;  %v1123_v7 = vsel %vm568_vm2, %v1118_v55, %v1122_v63  ;;  %v1352_v49 = vrot.slane %v1350_v10, 4 }
  0xfb   : > { %v491_v20 = vpop.f32.mrf.mxu1 }
  0xfc   : > { %v860_v23 = vadd.f32 %v831_v19, %v714_v17  ;;  %v980_v26 = vpop.f32.mrf.mxu0  ;;  %v492_v39 = vadd.f32 %v491_v20, %v3611_v34  ;;  %v1559_v34 = vrot.slane %v1557_v41, 3  ;;  %v1794_v17 = vlaneseq }
  0xfe   : > { %2925 = vmatmul.msk.bf16.gmra.mxu1 %vm320_vm1, %v1115_v21  ;;  %2934 = vmatmul.msk.bf16.gmra.mxu2 %vm320_vm1, %v1336_v13  ;;  %v3733_v37 = vadd.f32 %v977_v62, %v860_v23  ;;  %v3755_v2 = vor.u32 %v1562_v60, %v1559_v34  ;;  %v2919_v62 = vld [vmem:[%s3508_s29 + $0xd0] sm:$0xf]  ;;  %v3058_v13 = vld [vmem:[%s3508_s29 + $0x88] sm:$0xff]  ;;  %v3769_v23 = vshrl.u32 %v1794_v17, 7 }
  0xff   : > { %2991 = vmatmul.msk.bf16.gmra.mxu3 %vm320_vm1, %v1555_v27  ;;  %3000 = vmatmul.msk.bf16.gmra.mxu0 %vm320_vm1, %v3126_v31  ;;  %v3127_v21 = vld [vmem:[%s3508_s29 + $0x30] sm:$0xff]   ;;  %v3767_v22 = vor.u32 %v3050_v12, %v2919_v62  ;;  %v1566_v40 = vshrl.u32 %v3058_v13, 16  ;;  %v1569_v25 = vshll.u32 %v3058_v13, 16  ;;  %v3396_v62 = vmov 0  }
 0x100   : > { %v1814_v42 = vshrl.u32 %v3769_v23, 16 }
 0x101   : > { %v688_v43 = vpop.f32.mrf.mxu2  ;;  %v1128_v41 = vshll.u32 %v3767_v22, 16  ;;  %v1571_v34 = vrot.slane %v1569_v25, 4 }
 0x102   : > { %v715_v36 = vadd.f32 %v688_v43, %v492_v39  ;;  %v834_v44 = vpop.f32.mrf.mxu3  ;;  %v3784_v53 = vmul.u32 34953, %v1814_v42  ;;  %v1819_v55 = vmul.u32 34952, %v1814_v42  ;;  %v3813_v42 = vadd.s32 16, %v3769_v23 }
 0x103   : > { %v493_v48 = vpop.f32.mrf.mxu1  ;;  %v3787_v60 = vrot.slane %v1128_v41, 1 }
 0x104   : > { %v861_v58 = vadd.f32 %v834_v44, %v715_v36  ;;  %v982_v54 = vpop.f32.mrf.mxu0  ;;  %v494_v1 = vadd.f32 %v493_v48, %v3624_v47  ;;  %v1564_v47 = vsel %vm1283_vm3, %v1554_v16, %v3755_v2  ;;  %v1813_v16 = vand.u32 65535, %v3769_v23 }
 0x105   : > { %v1822_v61 = vshll.u32 %v3784_v53, 16 }
 0x106   : > { %v3750_v18 = vadd.f32 %v980_v26, %v861_v58  ;;  %v1347_v26 = vshrl.u32 %v1282_v14, 16  ;;  %v3782_v43 = vmul.u32 34952, %v1813_v16  ;;  %v1816_v51 = vmul.u32 34953, %v1813_v16 }
 0x107   : > { %v1126_v58 = vor.u32 %v1124_v32, %v1122_v63 }
 0x108   : > { %v1349_v45 = vrot.slane %v1347_v26, 3 }
 0x109   : > { %v690_v3 = vpop.f32.mrf.mxu2 }
 0x10a   : > { %v716_v5 = vadd.f32 %v690_v3, %v494_v1  ;;  %v836_v6 = vpop.f32.mrf.mxu3  ;;  %v3791_v3 = vadd.s32 8, %v3769_v23 }
 0x10b   : > { %v496_v15 = vpop.f32.mrf.mxu1 }
 0x10c   : > { %v862_v19 = vadd.f32 %v836_v6, %v716_v5  ;;  %v985_v20 = vpop.f32.mrf.mxu0  ;;  %v497_v31 = vadd.f32 %v496_v15, %v3644_v8  ;;  %v1820_v8 = vshll.u32 %v3782_v43, 16  ;;  %v3795_v6 = vor.u32 %v1352_v49, %v1349_v45 }
 0x10d   : > { %v1842_v15 = vand.u32 65535, %v3791_v3  ;;  %v1871_v45 = vand.u32 65535, %v3813_v42 }
 0x10e   : > { %2926 = vmatmul.msk.bf16.gmra.mxu1 %vm320_vm1, %v1123_v7  ;;  %2935 = vmatmul.msk.bf16.gmra.mxu2 %vm320_vm1, %v1345_v38  ;;  %v3773_v27 = vadd.f32 %v982_v54, %v862_v19  ;;  %v1568_v54 = vrot.slane %v1566_v40, 3  ;;  %vm1824_vm4 = vc.u32 %v1816_v51, %v1820_v8  ;;  %v1826_v1 = vadd.s32 %v1820_v8, %v1816_v51 }
 0x10f   : > { %2992 = vmatmul.msk.bf16.gmra.mxu3 %vm320_vm1, %v1564_v47  ;;  %3001 = vmatmul.msk.bf16.gmra.mxu0 %vm320_vm1, %v3127_v21  ;;  %v1825_v12 = vsel %vm1824_vm4, 1, %v3396_v62  ;;  %v1843_v38 = vshrl.u32 %v3791_v3, 16  ;;  %v1846_v21 = vmul.u32 34952, %v1842_v15  ;;  %v1845_v10 = vmul.u32 34953, %v1842_v15 }
 0x110   : > { %v3799_v14 = vor.u32 %v1571_v34, %v1568_v54  ;;  %vm1828_vm5 = vc.u32 %v1826_v1, %v1822_v61  ;;  %v1827_v47 = vadd.s32 %v1825_v12, %v1819_v55  ;;  %v1875_v54 = vmul.u32 34952, %v1871_v45 }
 0x111   : > { %v693_v39 = vpop.f32.mrf.mxu2  ;;  %v1829_v26 = vsel %vm1828_vm5, 1, %v3396_v62  ;;  %v1847_v16 = vmul.u32 34953, %v1843_v38  ;;  %v1849_v25 = vshll.u32 %v1846_v21, 16 }
 0x112   : > { %v717_v36 = vadd.f32 %v693_v39, %v497_v31  ;;  %v839_v44 = vpop.f32.mrf.mxu3  ;;  %v1573_v40 = vsel %vm1283_vm3, %v3755_v2, %v3799_v14  ;;  %v1848_v39 = vmul.u32 34952, %v1843_v38  ;;  %v1878_v15 = vshll.u32 %v1875_v54, 16 }
 0x113   : > { %v498_v48 = vpop.f32.mrf.mxu1  ;;  %v1851_v41 = vshll.u32 %v1847_v16, 16  ;;  %vm1853_vm6 = vc.u32 %v1845_v10, %v1849_v25  ;;  %v1852_v38 = vshrl.u32 %v1847_v16, 16 }
 0x114   : > { %v863_v28 = vadd.f32 %v839_v44, %v717_v36  ;;  %v987_v46 = vpop.f32.mrf.mxu0  ;;  %v499_v63 = vadd.f32 %v498_v48, %v3653_v30  ;;  %v1354_v30 = vsel %vm1283_vm3, %v3752_v0, %v3795_v6  ;;  %v1821_v0 = vshrl.u32 %v3782_v43, 16 }
 0x115   : > { %v1831_v36 = vadd.s32 %v1829_v26, %v1827_v47  ;;  %v1855_v44 = vadd.s32 %v1849_v25, %v1845_v10  ;;  %v1854_v2 = vsel %vm1853_vm6, 1, %v3396_v62  ;;  %v1850_v43 = vshrl.u32 %v1846_v21, 16 }
 0x116   : > { %v3793_v5 = vadd.f32 %v985_v20, %v863_v28  ;;  %v1131_v20 = vsel %vm568_vm2, %v1126_v58, %v3787_v60  ;;  %v1856_v51 = vadd.s32 %v1854_v2, %v1848_v39  ;;  %v1872_v58 = vshrl.u32 %v3813_v42, 16 }
 0x117   : > { %vm1857_vm7 = vc.u32 %v1855_v44, %v1851_v41  ;;  %v1832_v55 = vadd.s32 %v1831_v36, %v1821_v0  ;;  %v1132_v21 = vshrl.u32 %v3767_v22, 16  ;;  %v1879_v39 = vshrl.u32 %v1875_v54, 16 }
 0x118   : > { %v1858_v28 = vsel %vm1857_vm7, 1, %v3396_v62 }
 0x119   : > { %v695_v7 = vpop.f32.mrf.mxu2  ;;  %v1860_v1 = vadd.s32 %v1858_v28, %v1856_v51  ;;  %v1134_v44 = vor.u32 %v1132_v21, %v3787_v60 }
 0x11a   : > { %v718_v17 = vadd.f32 %v695_v7, %v499_v63  ;;  %v841_v19 = vpop.f32.mrf.mxu3  ;;  %v1876_v63 = vmul.u32 34953, %v1872_v58 }
 0x11b   : > { %v501_v13 = vpop.f32.mrf.mxu1 }
 0x11c   : > { %v864_v31 = vadd.f32 %v841_v19, %v718_v17  ;;  %v990_v32 = vpop.f32.mrf.mxu0  ;;  %v502_v49 = vadd.f32 %v501_v13, %v3613_v35  ;;  %v1861_v17 = vadd.s32 %v1860_v1, %v1850_v43  ;;  %v1877_v19 = vmul.u32 34952, %v1872_v58 }
 0x11d   : > { %v1881_v54 = vshrl.u32 %v1876_v63, 16  ;;  %v3844_v1 = vadd.s32 32, %v3769_v23 }
 0x11e   : > { %2927 = vmatmul.msk.bf16.gmra.mxu1 %vm320_vm1, %v1131_v20  ;;  %2936 = vmatmul.msk.bf16.gmra.mxu2 %vm320_vm1, %v1354_v30  ;;  %v3823_v48 = vadd.f32 %v987_v46, %v864_v31  ;;  %v1874_v46 = vmul.u32 34953, %v1871_v45  ;;  %v1880_v20 = vshll.u32 %v1876_v63, 16  ;;  %v1862_v31 = vadd.s32 %v1861_v17, %v1852_v38 }
 0x11f   : > { %2993 = vmatmul.msk.bf16.gmra.mxu3 %vm320_vm1, %v1573_v40  ;;  %3002 = vmatmul.msk.bf16.gmra.mxu0 %vm320_vm1, %v3744_v33  ;;  %v1823_v33 = vshrl.u32 %v3784_v53, 16  ;;  %v3832_v53 = vadd.s32 24, %v3769_v23 }
 0x120   : > { %vm1882_vm8 = vc.u32 %v1874_v46, %v1878_v15  ;;  %v1884_v47 = vadd.s32 %v1878_v15, %v1874_v46  ;;  %v1863_v58 = vshrl.u32 %v1862_v31, 3 }
 0x121   : > { %v698_v8 = vpop.f32.mrf.mxu2  ;;  %v1833_v13 = vadd.s32 %v1832_v55, %v1823_v33  ;;  %v1883_v30 = vsel %vm1882_vm8, 1, %v3396_v62  ;;  %v1900_v41 = vand.u32 65535, %v3832_v53  ;;  %v1901_v22 = vshrl.u32 %v3832_v53, 16 }
 0x122   : > { %v719_v34 = vadd.f32 %v698_v8, %v502_v49  ;;  %v844_v61 = vpop.f32.mrf.mxu3  ;;  %vm1886_vm9 = vc.u32 %v1884_v47, %v1880_v20  ;;  %v1885_v16 = vadd.s32 %v1883_v30, %v1877_v19  ;;  %v1864_v15 = vmul.u32 15, %v1863_v58 }
 0x123   : > { %v503_v12 = vpop.f32.mrf.mxu1  ;;  %v1887_v40 = vsel %vm1886_vm9, 1, %v3396_v62  ;;  %v1834_v2 = vshrl.u32 %v1833_v13, 3  ;;  %v1903_v49 = vmul.u32 34953, %v1900_v41  ;;  %v1904_v51 = vmul.u32 34952, %v1900_v41 }
 0x124   : > { %v865_v35 = vadd.f32 %v844_v61, %v719_v34  ;;  %v992_v7 = vpop.f32.mrf.mxu0  ;;  %v504_v10 = vadd.f32 %v503_v12, %v3628_v50  ;;  %v1889_v45 = vadd.s32 %v1887_v40, %v1885_v16  ;;  %v1673_v50 = vpack.c.b16 %v3748_v56, %v3748_v56 }
 0x125   : > { %v1905_v8 = vmul.u32 34953, %v1901_v22  ;;  %v1906_v61 = vmul.u32 34952, %v1901_v22  ;;  %v1907_v33 = vshll.u32 %v1904_v51, 16  ;;  %v1835_v56 = vmul.u32 15, %v1834_v2 }
 0x126   : > { %v3834_v26 = vadd.f32 %v990_v32, %v865_v35  ;;  %v1890_v34 = vadd.s32 %v1889_v45, %v1879_v39  ;;  %v1929_v12 = vand.u32 65535, %v3844_v1 }
 0x127   : > { %v1909_v55 = vshll.u32 %v1905_v8, 16  ;;  %vm1911_vm10 = vc.u32 %v1903_v49, %v1907_v33  ;;  %v1913_v60 = vadd.s32 %v1907_v33, %v1903_v49  ;;  %v3858_v47 = vsub.s32 %v3769_v23, %v1835_v56 }
 0x128   : > { %v1891_v35 = vadd.s32 %v1890_v34, %v1881_v54  ;;  %v1912_v38 = vsel %vm1911_vm10, 1, %v3396_v62  ;;  %v1910_v30 = vshrl.u32 %v1905_v8, 16  ;;  %v1933_v31 = vmul.u32 34952, %v1929_v12 }
 0x129   : > { %v700_v25 = vpop.f32.mrf.mxu2  ;;  %v1914_v19 = vadd.s32 %v1912_v38, %v1906_v61  ;;  %vm1915_vm11 = vc.u32 %v1913_v60, %v1909_v55  ;;  %vm2245_vm12 = vcmp.ne.s32.totalorder %v3858_v47, 0  ;;  %vm2260_vm14 = vcmp.lt.s32.totalorder %v3858_v47, 0 }
 0x12a   : > { %v720_v0 = vadd.f32 %v700_v25, %v504_v10  ;;  %v846_v36 = vpop.f32.mrf.mxu3  ;;  %v1916_v21 = vsel %vm1915_vm11, 1, %v3396_v62  ;;  %v1932_v10 = vmul.u32 34953, %v1929_v12  ;;  %v3863_v25 = vsub.s32 %v3791_v3, %v1864_v15  ;;  %vm3885_vm2 = vmand %vm2260_vm14, %vm2245_vm12 }
 0x12b   : > { %v506_v32 = vpop.f32.mrf.mxu1  ;;  %v1892_v39 = vshrl.u32 %v1891_v35, 3  ;;  %v3872_v3 = vadd.s32 15, %v3858_v47  ;;  %v1937_v61 = vshrl.u32 %v1933_v31, 16 }
 0x12c   : > { %v866_v43 = vadd.f32 %v846_v36, %v720_v0  ;;  %v995_v28 = vpop.f32.mrf.mxu0  ;;  %v507_v63 = vadd.f32 %v506_v32, %v3646_v9  ;;  %v1918_v9 = vadd.s32 %v1916_v21, %v1914_v19  ;;  %v1936_v36 = vshll.u32 %v1933_v31, 16 }
 0x12d   : > { %vm2246_vm15 = vcmp.ne.s32.totalorder %v3863_v25, 0  ;;  %v2291_v19 = vadd.s32 15, %v3863_v25  ;;  %v3894_v21 = vadd.s32 48, %v3769_v23 }
 0x12e   : > { %2928 = vmatmul.msk.bf16.gmra.mxu1 %vm320_vm1, %v1134_v44  ;;  %2937 = vmatmul.msk.bf16.gmra.mxu2 %vm320_vm1, %v3795_v6  ;;  %v3853_v46 = vadd.f32 %v992_v7, %v866_v43  ;;  %v1908_v6 = vshrl.u32 %v1904_v51, 16  ;;  %v1930_v7 = vshrl.u32 %v3844_v1, 16  ;;  %v3866_v44 = vadd.s32 40, %v3769_v23 }
 0x12f   : > { %2994 = vmatmul.msk.bf16.gmra.mxu3 %vm320_vm1, %v3799_v14  ;;  %3003 = vmatmul.msk.bf16.gmra.mxu0 %vm320_vm1, %v1673_v50  ;;  %vm1940_vm13 = vc.u32 %v1932_v10, %v1936_v36  ;;  %v1942_v32 = vadd.s32 %v1936_v36, %v1932_v10  ;;  %v1893_v43 = vmul.u32 15, %v1892_v39  ;;  %vm2261_vm1 = vcmp.lt.s32.totalorder %v3863_v25, 0 }
 0x130   : > { %v1934_v41 = vmul.u32 34953, %v1930_v7  ;;  %v1919_v22 = vadd.s32 %v1918_v9, %v1908_v6  ;;  %v1935_v0 = vmul.u32 34952, %v1930_v7  ;;  %v1958_v50 = vand.u32 65535, %v3866_v44  ;;  %vm3898_vm3 = vmand %vm2261_vm1, %vm2246_vm15 }
 0x131   : > { %v703_v17 = vpop.f32.mrf.mxu2  ;;  %v1941_v49 = vsel %vm1940_vm13, 1, %v3396_v62  ;;  %v1959_v33 = vshrl.u32 %v3866_v44, 16 }
 0x132   : > { %v721_v20 = vadd.f32 %v703_v17, %v507_v63  ;;  %v849_v14 = vpop.f32.mrf.mxu3  ;;  %v1938_v2 = vshll.u32 %v1934_v41, 16  ;;  %v1920_v45 = vadd.s32 %v1919_v22, %v1910_v30  ;;  %v1943_v54 = vadd.s32 %v1941_v49, %v1935_v0 }
 0x133   : > { %v508_v13 = vpop.f32.mrf.mxu1  ;;  %v1962_v55 = vmul.u32 34952, %v1958_v50  ;;  %v1939_v35 = vshrl.u32 %v1934_v41, 16  ;;  %v1963_v17 = vmul.u32 34953, %v1959_v33  ;;  %v1987_v41 = vand.u32 65535, %v3894_v21 }
 0x134   : > { %v867_v16 = vadd.f32 %v849_v14, %v721_v20  ;;  %v997_v40 = vpop.f32.mrf.mxu0  ;;  %v1921_v58 = vshrl.u32 %v1920_v45, 3  ;;  %vm1944_vm0 = vc.u32 %v1942_v32, %v1938_v2  ;;  %v3891_v20 = vsub.s32 %v3813_v42, %v1893_v43 }
 0x135   : > { %v1945_v12 = vsel %vm1944_vm0, 1, %v3396_v62  ;;  %v1965_v6 = vshll.u32 %v1962_v55, 16  ;;  %v1964_v14 = vmul.u32 34952, %v1959_v33  ;;  %v1967_v30 = vshll.u32 %v1963_v17, 16 }
 0x136   : > { %v3875_v51 = vadd.f32 %v995_v28, %v867_v16  ;;  %v1922_v60 = vmul.u32 15, %v1921_v58  ;;  %v1961_v28 = vmul.u32 34953, %v1958_v50  ;;  %v1947_v38 = vadd.s32 %v1945_v12, %v1943_v54 }
 0x137   : > { %v2305_v42 = vsel %vm3885_vm2, %v3872_v3, %v3858_v47  ;;  %v1966_v0 = vshrl.u32 %v1962_v55, 16  ;;  %v1988_v47 = vshrl.u32 %v3894_v21, 16  ;;  %vm2247_vm6 = vcmp.ne.s32.totalorder %v3891_v20, 0 }
 0x138   : > { %v1948_v13 = vadd.s32 %v1947_v38, %v1937_v61  ;;  %vm1969_vm4 = vc.u32 %v1961_v28, %v1965_v6  ;;  %v1971_v9 = vadd.s32 %v1965_v6, %v1961_v28  ;;  %v3908_v31 = vsub.s32 %v3832_v53, %v1922_v60 }
 0x139   : > { %v705_v8 = vpop.f32.mrf.mxu2  ;;  %v1970_v16 = vsel %vm1969_vm4, 1, %v3396_v62  ;;  %v1968_v3 = vshrl.u32 %v1963_v17, 16  ;;  %v1990_v49 = vmul.u32 34953, %v1987_v41  ;;  %v1992_v43 = vmul.u32 34953, %v1988_v47 }
 0x13a   : > { %v851_v34 = vpop.f32.mrf.mxu3  ;;  %v1949_v40 = vadd.s32 %v1948_v13, %v1939_v35  ;;  %v1972_v39 = vadd.s32 %v1970_v16, %v1964_v14  ;;  %vm1973_vm5 = vc.u32 %v1971_v9, %v1967_v30  ;;  %v1991_v8 = vmul.u32 34952, %v1987_v41 }
 0x13b   : > { %v1171_v56 = vpop.f32.mrf.mxu1  ;;  %v1974_v36 = vsel %vm1973_vm5, 1, %v3396_v62  ;;  %vm2262_vm7 = vcmp.lt.s32.totalorder %v3891_v20, 0  ;;  %vm2248_vm8 = vcmp.ne.s32.totalorder %v3908_v31, 0  ;;  %vm2263_vm9 = vcmp.lt.s32.totalorder %v3908_v31, 0 }
 0x13c   : > { %v1710_v63 = vpop.f32.mrf.mxu0  ;;  %v1210_v10 = vadd.f32 %v1171_v56, %v3669_v4  ;;  %v2306_v4 = vsel %vm3898_vm3, %v2291_v19, %v3863_v25  ;;  %v1950_v45 = vshrl.u32 %v1949_v40, 3  ;;  %v1976_v32 = vadd.s32 %v1974_v36, %v1972_v39  ;;  %vm3929_vm10 = vmand %vm2262_vm7, %vm2247_vm6 }
 0x13d   : > { %v1994_v61 = vshll.u32 %v1991_v8, 16  ;;  %v3922_v33 = vadd.s32 56, %v3769_v23  ;;  %v3925_v55 = vadd.s32 15, %v3891_v20  ;;  %v1993_v60 = vmul.u32 34952, %v1988_v47  ;;  %vm3948_vm14 = vmand %vm2263_vm9, %vm2248_vm8 }
 0x13e   : > { %v1977_v25 = vadd.s32 %v1976_v32, %v1966_v0  ;;  %v1951_v34 = vmul.u32 15, %v1950_v45  ;;  %v1996_v12 = vshll.u32 %v1992_v43, 16  ;;  %v3934_v35 = vadd.s32 15, %v3908_v31 }
 0x13f   : > { %vm1998_vm11 = vc.u32 %v1990_v49, %v1994_v61  ;;  %v2000_v38 = vadd.s32 %v1994_v61, %v1990_v49  ;;  %vm2320_vm12 = vcmp.lt.s32.totalorder %v2305_v42, 8  ;;  %vm3940_vm13 = vcmp.lt.s32.totalorder %v2306_v4, 8 }
 0x140   : > { %v1978_v56 = vadd.s32 %v1977_v25, %v1968_v3  ;;  %v3953_v14 = vsub.s32 %v3844_v1, %v1951_v34  ;;  %v1999_v7 = vsel %vm1998_vm11, 1, %v3396_v62  ;;  %v2016_v13 = vand.u32 65535, %v3922_v33 }
 0x141   : > { %v1391_v22 = vpop.f32.mrf.mxu2  ;;  %v2001_v42 = vadd.s32 %v1999_v7, %v1993_v60  ;;  %vm2002_vm15 = vc.u32 %v2000_v38, %v1996_v12  ;;  %v2307_v39 = vsel %vm3929_vm10, %v3925_v55, %v3891_v20  ;;  %v2308_v1 = vsel %vm3948_vm14, %v3934_v35, %v3908_v31 }
 0x142   : > { %v1430_v2 = vadd.f32 %v1391_v22, %v1210_v10  ;;  %v1610_v53 = vpop.f32.mrf.mxu3  ;;  %v1995_v10 = vshrl.u32 %v1991_v8, 16  ;;  %v2003_v41 = vsel %vm2002_vm15, 1, %v3396_v62  ;;  %v1997_v0 = vshrl.u32 %v1992_v43, 16 }
 0x143   : > { %v1173_v50 = vpop.f32.mrf.mxu1  ;;  %v2005_v36 = vadd.s32 %v2003_v41, %v2001_v42  ;;  %v2017_v47 = vshrl.u32 %v3922_v33, 16  ;;  %vm2249_vm0 = vcmp.ne.s32.totalorder %v3953_v14, 0  ;;  %vm2264_vm1 = vcmp.lt.s32.totalorder %v3953_v14, 0 }
 0x144   : > { %v1649_v58 = vadd.f32 %v1610_v53, %v1430_v2  ;;  %v1712_v54 = vpop.f32.mrf.mxu0  ;;  %v1211_v17 = vadd.f32 %v1173_v50, %v3680_v24  ;;  %v1979_v24 = vshrl.u32 %v1978_v56, 3  ;;  %v2020_v53 = vmul.u32 34952, %v2016_v13  ;;  %vm3982_vm2 = vmand %vm2264_vm1, %vm2249_vm0 }
 0x145   : > { %v2006_v45 = vadd.s32 %v2005_v36, %v1995_v10  ;;  %v2019_v32 = vmul.u32 34953, %v2016_v13  ;;  %v3970_v50 = vmul.u32 34953, %v2017_v47  ;;  %v3974_v49 = vadd.s32 15, %v3953_v14 }
 0x146   : > { %v1749_v28 = vadd.f32 %v1710_v63, %v1649_v58  ;;  %v1980_v2 = vmul.u32 15, %v1979_v24  ;;  %v2023_v8 = vshll.u32 %v2020_v53, 16  ;;  %v2022_v34 = vmul.u32 34952, %v2017_v47 }
 0x147   : > { %v2007_v25 = vadd.s32 %v2006_v45, %v1997_v0  ;;  %v3988_v60 = vadd.s32 64, %v3769_v23  ;;  %vm3998_vm4 = vcmp.lt.s32.totalorder %v2307_v39, 8  ;;  %v2309_v13 = vsel %vm3982_vm2, %v3974_v49, %v3953_v14 }
 0x148   : > { %v2365_v16 = vsel %vm2320_vm12, %v1749_v28, 0.0  ;;  %v3996_v15 = vsub.s32 %v3866_v44, %v1980_v2  ;;  %vm2027_vm3 = vc.u32 %v2019_v32, %v2023_v8  ;;  %vm4007_vm5 = vcmp.lt.s32.totalorder %v2308_v1, 8 }
 0x149   : > { %v1393_v19 = vpop.f32.mrf.mxu2  ;;  %v2401_v31 = vmul.f32 %v2365_v16, %v2365_v16  ;;  %v2008_v35 = vshrl.u32 %v2007_v25, 3  ;;  %v2028_v63 = vsel %vm2027_vm3, 1, %v3396_v62  ;;  %v2024_v10 = vshrl.u32 %v2020_v53, 16 }
 0x14a   : > { %v1431_v30 = vadd.f32 %v1393_v19, %v1211_v17  ;;  %v1612_v9 = vpop.f32.mrf.mxu3  ;;  %v2029_v19 = vadd.s32 %v2023_v8, %v2019_v32  ;;  %v2045_v42 = vand.u32 65535, %v3988_v60  ;;  %vm2250_vm7 = vcmp.ne.s32.totalorder %v3996_v15, 0 }
 0x14b   : > { %v1176_v40 = vpop.f32.mrf.mxu1  ;;  %v2009_v44 = vmul.u32 15, %v2008_v35  ;;  %v2026_v39 = vshrl.u32 %v3970_v50, 16  ;;  %vm2265_vm8 = vcmp.lt.s32.totalorder %v3996_v15, 0  ;;  %vm4072_vm15 = vcmp.lt.s32.totalorder %v2309_v13, 8 }
 0x14c   : > { %v1650_v22 = vadd.f32 %v1612_v9, %v1431_v30  ;;  %v1715_v4 = vpop.f32.mrf.mxu0  ;;  %v1212_v3 = vadd.f32 %v1176_v40, %v3686_v52  ;;  %v2025_v52 = vshll.u32 %v3970_v50, 16  ;;  %v2030_v30 = vadd.s32 %v2028_v63, %v2022_v34  ;;  %vm4047_vm12 = vmand %vm2265_vm8, %vm2250_vm7 }
 0x14d   : > { %v4019_v0 = vmul.u32 34952, %v2045_v42 }
 0x14e   : > { %v1750_v20 = vadd.f32 %v1712_v54, %v1650_v22  ;;  %vm2031_vm6 = vc.u32 %v2029_v19, %v2025_v52  ;;  %v4017_v22 = vsub.s32 %v3894_v21, %v2009_v44  ;;  %v4028_v21 = vadd.s32 72, %v3769_v23 }
 0x14f   : > { %v2032_v41 = vsel %vm2031_vm6, 1, %v3396_v62  ;;  %v2053_v17 = vshrl.u32 %v4019_v0, 16 }
 0x150   : > { %v3090_v43 = vpack.c.bf16 %v1750_v20, %v1749_v28  ;;  %v2366_v58 = vsel %vm3940_vm13, %v1750_v20, 0.0  ;;  %v2034_v1 = vadd.s32 %v2032_v41, %v2030_v30  ;;  %vm2251_vm9 = vcmp.ne.s32.totalorder %v4017_v22, 0 }
 0x151   : > { %v2380_v61 = vadd.f32 %v2366_v58, %v2365_v16  ;;  %v2402_v54 = vmul.f32 %v2366_v58, %v2366_v58  ;;  %v1396_v55 = vpop.f32.mrf.mxu2  ;;  %v2046_v16 = vshrl.u32 %v3988_v60, 16  ;;  %vm2266_vm10 = vcmp.lt.s32.totalorder %v4017_v22, 0 }
 0x152   : > { %3091 = vst [vmem:[%s3992_s14] sm:$0xff] %v3090_v43   ;;  %v1432_v12 = vadd.f32 %v1396_v55, %v1212_v3  ;;  %v1615_v28 = vpop.f32.mrf.mxu3  ;;  %v2035_v32 = vadd.s32 %v2034_v1, %v2024_v10  ;;  %v2295_v3 = vadd.s32 15, %v3996_v15  ;;  %v2052_v43 = vshll.u32 %v4019_v0, 16  ;;  %vm4058_vm14 = vmand %vm2266_vm10, %vm2251_vm9 }
 0x153   : > { %v2416_v38 = vadd.f32 %v2402_v54, %v2401_v31  ;;  %v1178_v6 = vpop.f32.mrf.mxu1  ;;  %v4021_v36 = vmul.u32 34953, %v2046_v16  ;;  %v2051_v8 = vmul.u32 34952, %v2046_v16  ;;  %v4036_v55 = vadd.s32 15, %v4017_v22 }
 0x154   : > { %v1651_v24 = vadd.f32 %v1615_v28, %v1432_v12  ;;  %v1717_v7 = vpop.f32.mrf.mxu0  ;;  %v1213_v2 = vadd.f32 %v1178_v6, %v3697_v11  ;;  %v2036_v11 = vadd.s32 %v2035_v32, %v2026_v39  ;;  %v2074_v35 = vand.u32 65535, %v4028_v21 }
 0x155   : > { %v2054_v34 = vshll.u32 %v4021_v36, 16  ;;  %v2075_v63 = vshrl.u32 %v4028_v21, 16 }
 0x156   : > { %v1751_v40 = vadd.f32 %v1715_v4, %v1651_v24  ;;  %v2048_v4 = vmul.u32 34953, %v2045_v42  ;;  %v2037_v52 = vshrl.u32 %v2036_v11, 3  ;;  %v2078_v30 = vmul.u32 34952, %v2074_v35 }
 0x157   : > { %v2079_v16 = vmul.u32 34953, %v2075_v63 }
 0x158   : > { %v2367_v47 = vsel %vm3998_vm4, %v1751_v40, 0.0  ;;  %vm2056_vm11 = vc.u32 %v2048_v4, %v2052_v43  ;;  %v2058_v28 = vadd.s32 %v2052_v43, %v2048_v4  ;;  %v2038_v44 = vmul.u32 15, %v2037_v52 }
 0x159   : > { %v2381_v53 = vadd.f32 %v2380_v61, %v2367_v47  ;;  %v2403_v20 = vmul.f32 %v2367_v47, %v2367_v47  ;;  %v1398_v45 = vpop.f32.mrf.mxu2  ;;  %v2057_v12 = vsel %vm2056_vm11, 1, %v3396_v62  ;;  %v2077_v47 = vmul.u32 34953, %v2074_v35 }
 0x15a   : > { %v1433_v50 = vadd.f32 %v1398_v45, %v1213_v2  ;;  %v1617_v31 = vpop.f32.mrf.mxu3  ;;  %v2059_v6 = vadd.s32 %v2057_v12, %v2051_v8  ;;  %vm2060_vm13 = vc.u32 %v2058_v28, %v2054_v34  ;;  %v2310_v2 = vsel %vm4047_vm12, %v2295_v3, %v3996_v15 }
 0x15b   : > { %v2417_v58 = vadd.f32 %v2416_v38, %v2403_v20  ;;  %v1181_v25 = vpop.f32.mrf.mxu1  ;;  %v2061_v42 = vsel %vm2060_vm13, 1, %v3396_v62  ;;  %v2055_v4 = vshrl.u32 %v4021_v36, 16  ;;  %v2311_v36 = vsel %vm4058_vm14, %v4036_v55, %v4017_v22 }
 0x15c   : > { %v1652_v61 = vadd.f32 %v1617_v31, %v1433_v50  ;;  %v1720_v54 = vpop.f32.mrf.mxu0  ;;  %v1214_v19 = vadd.f32 %v1181_v25, %v3703_v59  ;;  %v2063_v0 = vadd.s32 %v2061_v42, %v2059_v6  ;;  %v2080_v50 = vmul.u32 34952, %v2075_v63 }
 0x15d   : > { %v4077_v31 = vadd.s32 80, %v3769_v23  ;;  %v2083_v3 = vshll.u32 %v2079_v16, 16  ;;  %vm4083_vm0 = vcmp.lt.s32.totalorder %v2310_v2, 8  ;;  %v4088_v49 = vsub.s32 %v3922_v33, %v2038_v44 }
 0x15e   : > { %v1752_v38 = vadd.f32 %v1717_v7, %v1652_v61  ;;  %v2064_v56 = vadd.s32 %v2063_v0, %v2053_v17  ;;  %v2082_v13 = vshrl.u32 %v2078_v30, 16  ;;  %v2084_v35 = vshrl.u32 %v2079_v16, 16 }
 0x15f   : > { %v2103_v52 = vand.u32 65535, %v4077_v31  ;;  %v2104_v12 = vshrl.u32 %v4077_v31, 16  ;;  %v4098_v63 = vadd.s32 88, %v3769_v23  ;;  %vm2252_vm3 = vcmp.ne.s32.totalorder %v4088_v49, 0 }
 0x160   : > { %v3095_v7 = vpack.c.bf16 %v1752_v38, %v1751_v40  ;;  %v2368_v10 = vsel %vm4007_vm5, %v1752_v38, 0.0  ;;  %v2065_v11 = vadd.s32 %v2064_v56, %v2055_v4  ;;  %vm2267_vm4 = vcmp.lt.s32.totalorder %v4088_v49, 0 }
 0x161   : > { %v2382_v39 = vadd.f32 %v2381_v53, %v2368_v10  ;;  %v2404_v59 = vmul.f32 %v2368_v10, %v2368_v10  ;;  %v1401_v41 = vpop.f32.mrf.mxu2  ;;  %v2081_v53 = vshll.u32 %v2078_v30, 16  ;;  %v2107_v30 = vmul.u32 34952, %v2103_v52  ;;  %vm4125_vm8 = vmand %vm2267_vm4, %vm2252_vm3 }
 0x162   : > { %3129 = vst [vmem:[%s3992_s14 + $0x8] sm:$0xff] %v3095_v7   ;;  %v1434_v40 = vadd.f32 %v1401_v41, %v1214_v19  ;;  %v1620_v9 = vpop.f32.mrf.mxu3  ;;  %v2066_v33 = vshrl.u32 %v2065_v11, 3  ;;  %v4100_v7 = vmul.u32 34953, %v2104_v12  ;;  %v4105_v0 = vadd.s32 15, %v4088_v49 }
 0x163   : > { %v2418_v20 = vadd.f32 %v2417_v58, %v2404_v59  ;;  %v1183_v32 = vpop.f32.mrf.mxu1  ;;  %vm2085_vm1 = vc.u32 %v2077_v47, %v2081_v53  ;;  %v2087_v43 = vadd.s32 %v2081_v53, %v2077_v47  ;;  %v2106_v59 = vmul.u32 34953, %v2103_v52 }
 0x164   : > { %v1653_v8 = vadd.f32 %v1620_v9, %v1434_v40  ;;  %v1722_v15 = vpop.f32.mrf.mxu0  ;;  %v1215_v25 = vadd.f32 %v1183_v32, %v3714_v57  ;;  %v2086_v34 = vsel %vm2085_vm1, 1, %v3396_v62  ;;  %v2067_v44 = vmul.u32 15, %v2066_v33 }
 0x165   : > { %v2088_v61 = vadd.s32 %v2086_v34, %v2080_v50  ;;  %vm2089_vm2 = vc.u32 %v2087_v43, %v2083_v3  ;;  %v2110_v47 = vshll.u32 %v2107_v30, 16  ;;  %v2109_v2 = vmul.u32 34952, %v2104_v12 }
 0x166   : > { %v1753_v58 = vadd.f32 %v1720_v54, %v1653_v8  ;;  %v2090_v38 = vsel %vm2089_vm2, 1, %v3396_v62  ;;  %v4108_v40 = vsub.s32 %v3988_v60, %v2067_v44  ;;  %v2132_v4 = vand.u32 65535, %v4098_v63 }
 0x167   : > { %v2092_v57 = vadd.s32 %v2090_v38, %v2088_v61  ;;  %v2111_v45 = vshrl.u32 %v2107_v30, 16  ;;  %v2112_v32 = vshll.u32 %v4100_v7, 16  ;;  %v2113_v8 = vshrl.u32 %v4100_v7, 16 }
 0x168   : > { %v2369_v28 = vsel %vm4072_vm15, %v1753_v58, 0.0  ;;  %vm2114_vm5 = vc.u32 %v2106_v59, %v2110_v47  ;;  %v2116_v56 = vadd.s32 %v2110_v47, %v2106_v59  ;;  %v2133_v43 = vshrl.u32 %v4098_v63, 16 }
 0x169   : > { %v2383_v17 = vadd.f32 %v2382_v39, %v2369_v28  ;;  %v2405_v54 = vmul.f32 %v2369_v28, %v2369_v28  ;;  %v1403_v6 = vpop.f32.mrf.mxu2  ;;  %v2093_v16 = vadd.s32 %v2092_v57, %v2082_v13  ;;  %v2115_v13 = vsel %vm2114_vm5, 1, %v3396_v62 }
 0x16a   : > { %v1435_v19 = vadd.f32 %v1403_v6, %v1215_v25  ;;  %v1622_v24 = vpop.f32.mrf.mxu3  ;;  %vm2253_vm6 = vcmp.ne.s32.totalorder %v4108_v40, 0  ;;  %vm2268_vm7 = vcmp.lt.s32.totalorder %v4108_v40, 0  ;;  %v2117_v61 = vadd.s32 %v2115_v13, %v2109_v2 }
 0x16b   : > { %v2419_v10 = vadd.f32 %v2418_v20, %v2405_v54  ;;  %v1186_v42 = vpop.f32.mrf.mxu1  ;;  %v2094_v9 = vadd.s32 %v2093_v16, %v2084_v35  ;;  %vm2118_vm9 = vc.u32 %v2116_v56, %v2112_v32  ;;  %v2136_v35 = vmul.u32 34952, %v2132_v4  ;;  %vm4135_vm10 = vmand %vm2268_vm7, %vm2253_vm6 }
 0x16c   : > { %v1654_v41 = vadd.f32 %v1622_v24, %v1435_v19  ;;  %v1725_v39 = vpop.f32.mrf.mxu0  ;;  %v1216_v20 = vadd.f32 %v1186_v42, %v3723_v29  ;;  %v2119_v33 = vsel %vm2118_vm9, 1, %v3396_v62  ;;  %v2135_v57 = vmul.u32 34953, %v2132_v4 }
 0x16d   : > { %v2095_v50 = vshrl.u32 %v2094_v9, 3  ;;  %v2121_v6 = vadd.s32 %v2119_v33, %v2117_v61  ;;  %v2137_v19 = vmul.u32 34953, %v2133_v43  ;;  %vm2326_vm11 = vcmp.lt.s32.totalorder %v2311_v36, 8 }
 0x16e   : > { %v1754_v53 = vadd.f32 %v1722_v15, %v1654_v41  ;;  %v2312_v24 = vsel %vm4125_vm8, %v4105_v0, %v4088_v49  ;;  %v2138_v7 = vmul.u32 34952, %v2133_v43  ;;  %v4155_v22 = vadd.s32 96, %v3769_v23 }
 0x16f   : > { %v2096_v28 = vmul.u32 15, %v2095_v50  ;;  %v2122_v30 = vadd.s32 %v2121_v6, %v2111_v45  ;;  %v2141_v1 = vshll.u32 %v2137_v19, 16  ;;  %v2140_v45 = vshrl.u32 %v2136_v35, 16 }
 0x170   : > { %v3100_v3 = vpack.c.bf16 %v1754_v53, %v1753_v58  ;;  %v2370_v60 = vsel %vm4083_vm0, %v1754_v53, 0.0  ;;  %v2298_v58 = vadd.s32 15, %v4108_v40  ;;  %v2161_v4 = vand.u32 65535, %v4155_v22 }
 0x171   : > { %v2384_v15 = vadd.f32 %v2383_v17, %v2370_v60  ;;  %v2406_v25 = vmul.f32 %v2370_v60, %v2370_v60  ;;  %v1406_v29 = vpop.f32.mrf.mxu2  ;;  %v4152_v16 = vsub.s32 %v4028_v21, %v2096_v28  ;;  %v2123_v59 = vadd.s32 %v2122_v30, %v2113_v8 }
 0x172   : > { %3130 = vst [vmem:[%s3992_s14 + $0x10] sm:$0xff] %v3100_v3   ;;  %v1436_v11 = vadd.f32 %v1406_v29, %v1216_v20  ;;  %v1625_v34 = vpop.f32.mrf.mxu3  ;;  %v2313_v42 = vsel %vm4135_vm10, %v2298_v58, %v4108_v40  ;;  %vm4161_vm14 = vcmp.lt.s32.totalorder %v2312_v24, 8  ;;  %v2142_v60 = vshrl.u32 %v2137_v19, 16 }
 0x173   : > { %v2420_v52 = vadd.f32 %v2419_v10, %v2406_v25  ;;  %v1188_v12 = vpop.f32.mrf.mxu1  ;;  %v2139_v10 = vshll.u32 %v2136_v35, 16  ;;  %v2124_v2 = vshrl.u32 %v2123_v59, 3  ;;  %v2165_v43 = vmul.u32 34952, %v2161_v4 }
 0x174   : > { %v1655_v38 = vadd.f32 %v1625_v34, %v1436_v11  ;;  %v1727_v17 = vpop.f32.mrf.mxu0  ;;  %v1217_v36 = vadd.f32 %v1188_v12, %v3733_v37  ;;  %v2162_v37 = vshrl.u32 %v4155_v22, 16  ;;  %vm4168_vm15 = vcmp.lt.s32.totalorder %v2313_v42, 8 }
 0x175   : > { %vm2143_vm12 = vc.u32 %v2135_v57, %v2139_v10  ;;  %v2145_v47 = vadd.s32 %v2139_v10, %v2135_v57  ;;  %v2125_v56 = vmul.u32 15, %v2124_v2  ;;  %v2164_v11 = vmul.u32 34953, %v2161_v4 }
 0x176   : > { %v1755_v44 = vadd.f32 %v1725_v39, %v1655_v38  ;;  %v2144_v0 = vsel %vm2143_vm12, 1, %v3396_v62  ;;  %v4173_v34 = vadd.s32 104, %v3769_v23  ;;  %vm2254_vm0 = vcmp.ne.s32.totalorder %v4152_v16, 0 }
 0x177   : > { %v2146_v21 = vadd.s32 %v2144_v0, %v2138_v7  ;;  %vm2147_vm13 = vc.u32 %v2145_v47, %v2141_v1  ;;  %v2168_v61 = vshll.u32 %v2165_v43, 16  ;;  %v4180_v28 = vsub.s32 %v4077_v31, %v2125_v56 }
 0x178   : > { %v2371_v55 = vsel %vm2326_vm11, %v1755_v44, 0.0  ;;  %v2148_v3 = vsel %vm2147_vm13, 1, %v3396_v62  ;;  %v2167_v33 = vmul.u32 34952, %v2162_v37  ;;  %v2190_v24 = vand.u32 65535, %v4173_v34 }
 0x179   : > { %v2385_v49 = vadd.f32 %v2384_v15, %v2371_v55  ;;  %v2407_v41 = vmul.f32 %v2371_v55, %v2371_v55  ;;  %v1408_v39 = vpop.f32.mrf.mxu2  ;;  %v2150_v13 = vadd.s32 %v2148_v3, %v2146_v21  ;;  %v4166_v15 = vmul.u32 34953, %v2162_v37 }
 0x17a   : > { %v1437_v9 = vadd.f32 %v1408_v39, %v1217_v36  ;;  %v1627_v40 = vpop.f32.mrf.mxu3  ;;  %vm2172_vm1 = vc.u32 %v2164_v11, %v2168_v61  ;;  %v2174_v19 = vadd.s32 %v2168_v61, %v2164_v11  ;;  %vm2269_vm2 = vcmp.lt.s32.totalorder %v4152_v16, 0 }
 0x17b   : > { %v2421_v53 = vadd.f32 %v2420_v52, %v2407_v41  ;;  %v1191_v20 = vpop.f32.mrf.mxu1  ;;  %v2151_v58 = vadd.s32 %v2150_v13, %v2140_v45  ;;  %v2170_v6 = vshll.u32 %v4166_v15, 16  ;;  %v2299_v31 = vadd.s32 15, %v4152_v16  ;;  %vm4193_vm6 = vmand %vm2269_vm2, %vm2254_vm0 }
 0x17c   : > { %v1656_v32 = vadd.f32 %v1627_v40, %v1437_v9  ;;  %v1730_v8 = vpop.f32.mrf.mxu0  ;;  %v1218_v14 = vadd.f32 %v1191_v20, %v3750_v18  ;;  %v2173_v7 = vsel %vm2172_vm1, 1, %v3396_v62  ;;  %vm2255_vm3 = vcmp.ne.s32.totalorder %v4180_v28, 0 }
 0x17d   : > { %v2152_v54 = vadd.s32 %v2151_v58, %v2142_v60  ;;  %v2169_v1 = vshrl.u32 %v2165_v43, 16  ;;  %v2175_v55 = vadd.s32 %v2173_v7, %v2167_v33  ;;  %vm2270_vm4 = vcmp.lt.s32.totalorder %v4180_v28, 0 }
 0x17e   : > { %v1756_v25 = vadd.f32 %v1727_v17, %v1656_v32  ;;  %vm2176_vm5 = vc.u32 %v2174_v19, %v2170_v6  ;;  %v2191_v59 = vshrl.u32 %v4173_v34, 16  ;;  %v4198_v39 = vadd.s32 15, %v4180_v28  ;;  %vm4217_vm7 = vmand %vm2270_vm4, %vm2255_vm3 }
 0x17f   : > { %v2153_v36 = vshrl.u32 %v2152_v54, 3  ;;  %v2177_v0 = vsel %vm2176_vm5, 1, %v3396_v62  ;;  %v2194_v47 = vmul.u32 34952, %v2190_v24  ;;  %v2193_v40 = vmul.u32 34953, %v2190_v24 }
 0x180   : > { %v3105_v52 = vpack.c.bf16 %v1756_v25, %v1755_v44  ;;  %v2372_v12 = vsel %vm4161_vm14, %v1756_v25, 0.0  ;;  %v2179_v9 = vadd.s32 %v2177_v0, %v2175_v55  ;;  %v4201_v2 = vmul.u32 34953, %v2191_v59 }
 0x181   : > { %v2386_v35 = vadd.f32 %v2385_v49, %v2372_v12  ;;  %v2408_v38 = vmul.f32 %v2372_v12, %v2372_v12  ;;  %v1411_v17 = vpop.f32.mrf.mxu2  ;;  %v4204_v21 = vadd.s32 112, %v3769_v23  ;;  %v2171_v20 = vshrl.u32 %v4166_v15, 16 }
 0x182   : > { %3131 = vst [vmem:[%s3992_s14 + $0x18] sm:$0xff] %v3105_v52   ;;  %v1438_v18 = vadd.f32 %v1411_v17, %v1218_v14  ;;  %v1630_v57 = vpop.f32.mrf.mxu3  ;;  %v2197_v45 = vshll.u32 %v2194_v47, 16  ;;  %v2154_v56 = vmul.u32 15, %v2153_v36  ;;  %v2180_v60 = vadd.s32 %v2179_v9, %v2169_v1 }
 0x183   : > { %v2422_v44 = vadd.f32 %v2421_v53, %v2408_v38  ;;  %v1193_v30 = vpop.f32.mrf.mxu1  ;;  %v2196_v13 = vmul.u32 34952, %v2191_v59  ;;  %v2199_v43 = vshll.u32 %v4201_v2, 16  ;;  %v2315_v61 = vsel %vm4217_vm7, %v4198_v39, %v4180_v28 }
 0x184   : > { %v1657_v10 = vadd.f32 %v1630_v57, %v1438_v18  ;;  %v1732_v42 = vpop.f32.mrf.mxu0  ;;  %v1219_v53 = vadd.f32 %v1193_v30, %v3773_v27  ;;  %vm2201_vm8 = vc.u32 %v2193_v40, %v2197_v45  ;;  %v2203_v29 = vadd.s32 %v2197_v45, %v2193_v40 }
 0x185   : > { %v2181_v52 = vadd.s32 %v2180_v60, %v2171_v20  ;;  %v4232_v12 = vsub.s32 %v4098_v63, %v2154_v56  ;;  %v2202_v33 = vsel %vm2201_vm8, 1, %v3396_v62  ;;  %v2198_v17 = vshrl.u32 %v2194_v47, 16 }
 0x186   : > { %v1757_v49 = vadd.f32 %v1730_v8, %v1657_v10  ;;  %v2314_v8 = vsel %vm4193_vm6, %v2299_v31, %v4152_v16  ;;  %v2219_v16 = vand.u32 65535, %v4204_v21  ;;  %vm2205_vm10 = vc.u32 %v2203_v29, %v2199_v43 }
 0x187   : > { %vm4223_vm9 = vcmp.lt.s32.totalorder %v2314_v8, 8  ;;  %v2204_v54 = vadd.s32 %v2202_v33, %v2196_v13  ;;  %v2206_v6 = vsel %vm2205_vm10, 1, %v3396_v62  ;;  %v2182_v18 = vshrl.u32 %v2181_v52, 3 }
 0x188   : > { %v2373_v4 = vsel %vm4168_vm15, %v1757_v49, 0.0  ;;  %v2222_v57 = vmul.u32 34953, %v2219_v16  ;;  %v2223_v19 = vmul.u32 34952, %v2219_v16  ;;  %vm2330_vm12 = vcmp.lt.s32.totalorder %v2315_v61, 8 }
 0x189   : > { %v2387_v37 = vadd.f32 %v2386_v35, %v2373_v4  ;;  %v2409_v32 = vmul.f32 %v2373_v4, %v2373_v4  ;;  %v1413_v50 = vpop.f32.mrf.mxu2  ;;  %v2220_v35 = vshrl.u32 %v4204_v21, 16  ;;  %v2208_v30 = vadd.s32 %v2206_v6, %v2204_v54 }
 0x18a   : > { %v1439_v27 = vadd.f32 %v1413_v50, %v1219_v53  ;;  %v1632_v3 = vpop.f32.mrf.mxu3  ;;  %v2226_v1 = vshll.u32 %v2223_v19, 16  ;;  %v2183_v47 = vmul.u32 15, %v2182_v18  ;;  %vm2256_vm13 = vcmp.ne.s32.totalorder %v4232_v12, 0 }
 0x18b   : > { %v2423_v15 = vadd.f32 %v2422_v44, %v2409_v32  ;;  %v1196_v25 = vpop.f32.mrf.mxu1  ;;  %v2224_v24 = vmul.u32 34953, %v2220_v35  ;;  %v2209_v59 = vadd.s32 %v2208_v30, %v2198_v17  ;;  %v2225_v41 = vmul.u32 34952, %v2220_v35 }
 0x18c   : > { %v1658_v11 = vadd.f32 %v1632_v3, %v1439_v27  ;;  %v1735_v58 = vpop.f32.mrf.mxu0  ;;  %v1220_v44 = vadd.f32 %v1196_v25, %v3793_v5  ;;  %vm2230_vm11 = vc.u32 %v2222_v57, %v2226_v1  ;;  %v2232_v9 = vadd.s32 %v2226_v1, %v2222_v57 }
 0x18d   : > { %v2228_v39 = vshll.u32 %v2224_v24, 16  ;;  %vm2271_vm14 = vcmp.lt.s32.totalorder %v4232_v12, 0  ;;  %v2231_v53 = vsel %vm2230_vm11, 1, %v3396_v62  ;;  %v2227_v45 = vshrl.u32 %v2223_v19, 16 }
 0x18e   : > { %v1758_v38 = vadd.f32 %v1732_v42, %v1658_v11  ;;  %v2200_v42 = vshrl.u32 %v4201_v2, 16  ;;  %v2301_v2 = vadd.s32 15, %v4232_v12  ;;  %vm4247_vm0 = vmand %vm2271_vm14, %vm2256_vm13  ;;  %v2184_v8 = vsub.s32 %v4155_v22, %v2183_v47 }
 0x18f   : > { %vm2234_vm15 = vc.u32 %v2232_v9, %v2228_v39  ;;  %v2229_v3 = vshrl.u32 %v2224_v24, 16 }
 0x190   : > { %v3110_v28 = vpack.c.bf16 %v1758_v38, %v1757_v49  ;;  %v2374_v63 = vsel %vm4223_vm9, %v1758_v38, 0.0  ;;  %v2210_v4 = vadd.s32 %v2209_v59, %v2200_v42  ;;  %v2235_v32 = vsel %vm2234_vm15, 1, %v3396_v62 }
 0x191   : > { %v2388_v31 = vadd.f32 %v2387_v37, %v2374_v63  ;;  %v2410_v7 = vmul.f32 %v2374_v63, %v2374_v63  ;;  %v1416_v10 = vpop.f32.mrf.mxu2  ;;  %v2233_v37 = vadd.s32 %v2231_v53, %v2225_v41  ;;  %v2316_v62 = vsel %vm4247_vm0, %v2301_v2, %v4232_v12 }
 0x192   : > { %3132 = vst [vmem:[%s3992_s14 + $0x20] sm:$0xff] %v3110_v28   ;;  %v1440_v55 = vadd.f32 %v1416_v10, %v1220_v44  ;;  %v1635_v36 = vpop.f32.mrf.mxu3  ;;  %v2211_v23 = vshrl.u32 %v2210_v4, 3  ;;  %vm2257_vm1 = vcmp.ne.s32.totalorder %v2184_v8, 0  ;;  %vm2272_vm2 = vcmp.lt.s32.totalorder %v2184_v8, 0 }
 0x193   : > { %v2424_v0 = vadd.f32 %v2423_v15, %v2410_v7  ;;  %v1198_v49 = vpop.f32.mrf.mxu1  ;;  %v2237_v60 = vadd.s32 %v2235_v32, %v2233_v37  ;;  %vm2331_vm3 = vcmp.lt.s32.totalorder %v2316_v62, 8  ;;  %v2302_v33 = vadd.s32 15, %v2184_v8  ;;  %vm4256_vm4 = vmand %vm2272_vm2, %vm2257_vm1 }
 0x194   : > { %v1659_v40 = vadd.f32 %v1635_v36, %v1440_v55  ;;  %v1737_v5 = vpop.f32.mrf.mxu0  ;;  %v1221_v27 = vadd.f32 %v1198_v49, %v3823_v48 }
 0x195   : > { %v2238_v16 = vadd.s32 %v2237_v60, %v2227_v45  ;;  %v2317_v63 = vsel %vm4256_vm4, %v2302_v33, %v2184_v8 }
 0x196   : > { %v1759_v20 = vadd.f32 %v1735_v58, %v1659_v40  ;;  %v2212_v58 = vmul.u32 15, %v2211_v23  ;;  %vm2332_vm7 = vcmp.lt.s32.totalorder %v2317_v63, 8 }
 0x197   : > { %v2239_v48 = vadd.s32 %v2238_v16, %v2229_v3 }
 0x198   : > { %v2375_v56 = vsel %vm2330_vm12, %v1759_v20, 0.0  ;;  %v2213_v38 = vsub.s32 %v4173_v34, %v2212_v58 }
 0x199   : > { %v2389_v13 = vadd.f32 %v2388_v31, %v2375_v56  ;;  %v2411_v43 = vmul.f32 %v2375_v56, %v2375_v56  ;;  %v1418_v15 = vpop.f32.mrf.mxu2  ;;  %v2240_v6 = vshrl.u32 %v2239_v48, 3 }
 0x19a   : > { %v1441_v25 = vadd.f32 %v1418_v15, %v1221_v27  ;;  %v1637_v29 = vpop.f32.mrf.mxu3  ;;  %vm2258_vm5 = vcmp.ne.s32.totalorder %v2213_v38, 0  ;;  %vm2273_vm6 = vcmp.lt.s32.totalorder %v2213_v38, 0 }
 0x19b   : > { %v2425_v11 = vadd.f32 %v2424_v0, %v2411_v43  ;;  %v1201_v14 = vpop.f32.mrf.mxu1  ;;  %v2241_v34 = vmul.u32 15, %v2240_v6  ;;  %vm4265_vm8 = vmand %vm2273_vm6, %vm2258_vm5 }
 0x19c   : > { %v1660_v22 = vadd.f32 %v1637_v29, %v1441_v25  ;;  %v1740_v61 = vpop.f32.mrf.mxu0  ;;  %v1222_v54 = vadd.f32 %v1201_v14, %v3834_v26  ;;  %v2303_v26 = vadd.s32 15, %v2213_v38 }
 0x19d   : > { %v2242_v36 = vsub.s32 %v4204_v21, %v2241_v34 }
 0x19e   : > { %v1760_v52 = vadd.f32 %v1737_v5, %v1660_v22  ;;  %v2318_v47 = vsel %vm4265_vm8, %v2303_v26, %v2213_v38 }
 0x19f   : > { %vm2259_vm9 = vcmp.ne.s32.totalorder %v2242_v36, 0  ;;  %vm2274_vm10 = vcmp.lt.s32.totalorder %v2242_v36, 0  ;;  %vm2333_vm11 = vcmp.lt.s32.totalorder %v2318_v47, 8  ;;  %v2304_v4 = vadd.s32 15, %v2242_v36 }
 0x1a0   : > { %v3115_v12 = vpack.c.bf16 %v1760_v52, %v1759_v20  ;;  %v2376_v17 = vsel %vm2331_vm3, %v1760_v52, 0.0  ;;  %vm4274_vm12 = vmand %vm2274_vm10, %vm2259_vm9 }
 0x1a1   : > { %v2390_v18 = vadd.f32 %v2389_v13, %v2376_v17  ;;  %v2412_v57 = vmul.f32 %v2376_v17, %v2376_v17  ;;  %v1421_v19 = vpop.f32.mrf.mxu2  ;;  %v2319_v56 = vsel %vm4274_vm12, %v2304_v4, %v2242_v36 }
 0x1a2   : > { %3133 = vst [vmem:[%s3992_s14 + $0x28] sm:$0xff] %v3115_v12   ;;  %v1442_v24 = vadd.f32 %v1421_v19, %v1222_v54  ;;  %v1640_v28 = vpop.f32.mrf.mxu3  ;;  %vm2334_vm13 = vcmp.lt.s32.totalorder %v2319_v56, 8 }
 0x1a3   : > { %v2426_v44 = vadd.f32 %v2425_v11, %v2412_v57  ;;  %v1203_v30 = vpop.f32.mrf.mxu1 }
 0x1a4   : > { %v1661_v31 = vadd.f32 %v1640_v28, %v1442_v24  ;;  %v1742_v7 = vpop.f32.mrf.mxu0  ;;  %v1223_v55 = vadd.f32 %v1203_v30, %v3853_v46 }
 0x1a6   : > { %v1761_v10 = vadd.f32 %v1740_v61, %v1661_v31 }
 0x1a8   : > { %v2377_v1 = vsel %vm2332_vm7, %v1761_v10, 0.0 }
 0x1a9   : > { %v2391_v59 = vadd.f32 %v2390_v18, %v2377_v1  ;;  %v2413_v41 = vmul.f32 %v2377_v1, %v2377_v1  ;;  %v1423_v39 = vpop.f32.mrf.mxu2 }
 0x1aa   : > { %v1443_v0 = vadd.f32 %v1423_v39, %v1223_v55  ;;  %v1642_v49 = vpop.f32.mrf.mxu3 }
 0x1ab   : > { %v2427_v9 = vadd.f32 %v2426_v44, %v2413_v41  ;;  %v1206_v40 = vpop.f32.mrf.mxu1 }
 0x1ac   : > { %v1662_v5 = vadd.f32 %v1642_v49, %v1443_v0  ;;  %v1745_v2 = vpop.f32.mrf.mxu0  ;;  %v1224_v45 = vadd.f32 %v1206_v40, %v3875_v51 }
 0x1ae   : > { %v1762_v46 = vadd.f32 %v1742_v7, %v1662_v5 }
 0x1b0   : > { %v3120_v53 = vpack.c.bf16 %v1762_v46, %v1761_v10  ;;  %v2378_v20 = vsel %vm2333_vm11, %v1762_v46, 0.0 }
 0x1b1   : > { %v2392_v37 = vadd.f32 %v2391_v59, %v2378_v20  ;;  %v2414_v32 = vmul.f32 %v2378_v20, %v2378_v20  ;;  %v1426_v50 = vpop.f32.mrf.mxu2 }
 0x1b2   : > { %3134 = vst [vmem:[%s3992_s14 + $0x30] sm:$0xff] %v3120_v53   ;;  %v1444_v8 = vadd.f32 %v1426_v50, %v1224_v45  ;;  %v1645_v23 = vpop.f32.mrf.mxu3 }
 0x1b3   : > { %v2428_v27 = vadd.f32 %v2427_v9, %v2414_v32  ;;  %v1208_v3 = vpop.f32.mrf.mxu1 }
 0x1b4   : > { %v1663_v60 = vadd.f32 %v1645_v23, %v1444_v8  ;;  %v1747_v13 = vpop.f32.mrf.mxu0 }
 0x1b6   : > { %v1763_v51 = vadd.f32 %v1745_v2, %v1663_v60 }
 0x1b8   : > { %v1778_v43 = vpack.c.bf16 %v1763_v51, %v1763_v51  ;;  %v2379_v15 = vsel %vm2334_vm13, %v1763_v51, 0.0 }
 0x1b9   : > { %v2393_v25 = vadd.f32 %v2392_v37, %v2379_v15  ;;  %v2415_v29 = vmul.f32 %v2379_v15, %v2379_v15  ;;  %v1428_v62 = vpop.f32.mrf.mxu2 }
 0x1ba   : > { %1793 = vst [vmem:[%s3992_s14 + $0x38] sm:$0xf] %v1778_v43  ;;  %v1647_v16 = vpop.f32.mrf.mxu3 }
 0x1bb   : > { %v2394_v11 = vrot.slane %v2393_v25, 4  ;;  %v2429_v14 = vadd.f32 %v2428_v27, %v2415_v29 }
 0x1bc   : > { %3283 = shalt.err (!%p3280_p5)
}
 0x1bd   : > { %s3397_s14 = smov 64   ;;  %s3398_s29 = smov 4   ;;  %v2395_v58 = vadd.f32 %v2394_v11, %v2393_v25  ;;  %v2430_v22 = vrot.slane %v2429_v14, 4 }
 0x1be   : > { %3188 = dma.vmem_to_hbm [thread:$0]  (%p3466_p4), %s4286_s5, 960, %s2462_s6, %s2438_s7, %s3397_s14, %s3397_s14, %s3398_s29  }
 0x1bf   : > { %v2431_v61 = vadd.f32 %v2430_v22, %v2429_v14  ;;  %v2396_v48 = vrot.slane %v2395_v58, 2  ;;  %s2474_s9 = scalar_lea.hbm %s4381_s3, %s3386_s18  ;;  %s4307_s10 = sand.u32 1, %s2632_s21  }
 0x1c0   : > { %s2488_s24 = scalar_lea.hbm %s4382_s4, %s3386_s18  ;;  %s231_s26 = scalar_lea.vmem [#allocation4], %s3938_s12 }
 0x1c1   : > { %v2432_v52 = vrot.slane %v2431_v61, 2  ;;  %v2397_v33 = vadd.f32 %v2396_v48, %v2395_v58  ;;  %s4314_s5 = sshll.u32 %s231_s26, 4  ;;  %s4316_s6 = sshll.u32 %s2474_s9, 4  ;;  %s2477_s5 = int_to_ptr.vmem [resolvable:$true] %s4314_s5  ;;  %s2479_s6 = int_to_ptr.hbm [resolvable:$true] %s4316_s6 }
 0x1c2   : > { %s237_s7 = scalar_lea.vmem [#allocation6], %s3938_s12  ;;  %s4321_s14 = sshll.u32 %s2488_s24, 4  ;;  %s2493_s14 = int_to_ptr.hbm [resolvable:$true] %s4321_s14 }
 0x1c3   : > { %v2398_v35 = vrot.slane %v2397_v33, 1  ;;  %v2433_v38 = vadd.f32 %v2432_v52, %v2431_v61  ;;  %s4319_s21 = sshll.u32 %s237_s7, 4  ;;  %s2443_s18 = scalar_lea.sflag [#allocation5], %s4307_s10  ;;  %s2491_s21 = int_to_ptr.vmem [resolvable:$true] %s4319_s21 }
 0x1c4   : > { %s3298_s29 = sshra.s32 %s2479_s6, 4  ;;  %s3304_s9 = scalar_lea.hbm %s4381_s3, 2  ;;  %s3299_s29 = int_to_ptr.hbm [resolvable:$true] %s3298_s29 }
 0x1c5   : > { %v2399_v12 = vadd.f32 %v2398_v35, %v2397_v33  ;;  %v2434_v17 = vrot.slane %v2433_v38, 1  ;;  %s3300_s30 = scalar_lea.hbm %s3299_s29, 1  ;;  %p3305_p10 = scmp.lt.s32.totalorder %s3299_s29, %s4381_s3 }
 0x1c6   : > { %p3301_p6 = scmp.ne.s32.totalorder %s3299_s29, %s3300_s30  ;;  %p3306_p11 = scmp.lt.s32.totalorder %s3304_s9, %s3300_s30 }
 0x1c7   : > { %2400 = vst [vmem:[%s231_s26] sm:$0x1] %v2399_v12  ;;  %v2435_v54 = vadd.f32 %v2434_v17, %v2433_v38 }
 0x1c8   : > { %p3302_p7 = pnand %p3301_p6, %p3466_p4  ;;  %p3307_p12 = por %p3306_p11, %p3305_p10 }
 0x1ca   : > { %p3303_p9 = pneg %p3302_p7 }
 0x1cc   : > { %p3308_p13 = pnand %p3307_p12, %p3303_p9 }
 0x1ce   : > { %3311 = shalt.err (!%p3308_p13)
}
 0x1cf   : > { %3189 = dma.vmem_to_hbm [thread:$0]  (%p3466_p4), %s2477_s5, 16, %s2479_s6, %s2443_s18   ;;  %2436 = vst [vmem:[%s237_s7] sm:$0x1] %v2435_v54 }
 0x1d0   : > { %s3326_s10 = sshra.s32 %s2493_s14, 4  ;;  %s3332_s30 = scalar_lea.hbm %s4382_s4, 2  ;;  %s3327_s10 = int_to_ptr.hbm [resolvable:$true] %s3326_s10 }
 0x1d1   : > { %s3328_s24 = scalar_lea.hbm %s3327_s10, 1  ;;  %p3333_p3 = scmp.lt.s32.totalorder %s3327_s10, %s4382_s4 }
 0x1d2   : > { %p3329_p0 = scmp.ne.s32.totalorder %s3327_s10, %s3328_s24  ;;  %p3334_p5 = scmp.lt.s32.totalorder %s3332_s30, %s3328_s24 }
 0x1d4   : > { %p3330_p1 = pnand %p3329_p0, %p3466_p4  ;;  %p3335_p6 = por %p3334_p5, %p3333_p3 }
 0x1d6   : > { %p3331_p2 = pneg %p3330_p1 }
 0x1d8   : > { %p3336_p7 = pnand %p3335_p6, %p3331_p2 }
 0x1da   : > { %3339 = shalt.err (!%p3336_p7)
}
 0x1db   : > { %3190 = dma.vmem_to_hbm [thread:$0]  (%p3466_p4), %s2491_s21, 16, %s2493_s14, %s2443_s18  }
 0x1dc PF: > { %p3204_p9 = scmp.ge.s32.totalorder %s3394_s20, 2  ;;  %s2504_s5 = sand.u32 1, %s3374_s15  }
 0x1dd   : > { %s2505_s6 = scalar_lea.sflag [#allocation3], %s2504_s5 }
 0x1de   : > { %p3195_p10 = pnand %p3204_p9, %p3475_p8 }
 0x1e0   : > { %p3196_p11 = pneg %p3195_p10 }
 0x1e2   : > { %3365 = dma.done.wait (%p3196_p11), %s2505_s6, 960  }
 0x1e3   : > { %3367 = vsyncadd (%p3196_p11), %s2505_s6, 4294966336  ;;  %s2514_s25 = sand.u32 1, %s2633_s22  }
 0x1e4   : > { %s2515_s7 = scalar_lea.sflag [#allocation5], %s2514_s25 }
 0x1e5   : > { %3369 = dma.done.wait (%p3196_p11), %s2515_s7, 32  }
 0x1e6   : > { %3371 = vsyncadd (%p3196_p11), %s2515_s7, 4294967264  ;;  %s21_s20 = sadd.s32 1, %s3394_s20   ;;  %s4431_s15 = smov %s3378_s16 }
 0x1e7   : > { %p18_p4 = scmp.ge.s32.totalorder %s21_s20, 4   ;;  %s4432_s16 = smov %s3382_s17 }
 0x1e8   : > { %s4433_s17 = smov %s3481_s28  ;;  %s4434_s18 = smov %s3390_s19 }
 0x1e9   : > { %s4435_s19 = smov %s4437_s23  ;;  %20 = sbr.rel (!%p18_p4) target bundleno = 6 (0x6), region = 109 }
 0x1ee   :  { %2529 = vsyncpa [#allocation3], 1 }
 0x1ef   :  { %2531 = vsyncpa [#allocation3 + $0x1], 1 }
 0x1f0   :  { %2532 = vsyncpa [#allocation5], 1 }
 0x1f1   :  { %2534 = vsyncpa [#allocation5 + $0x1], 1 }

</bundles_post_ra>
